<compile_context>
chip_gen: v5e
topology: v5e:2x2
jax: 0.10.0
libtpu: 0.0.40
codegen_flags: <defaults>
</compile_context>

<pallas_src>
import functools
import math

import jax
import jax.numpy as jnp
from jax import lax
from jax.experimental import pallas as pl
from jax.experimental.pallas import tpu as pltpu


# ------------------------------ small helpers --------------------------------

def _round_up(x, m):
    return (x + m - 1) // m * m


def _gammas(heads):
    """torch: 1 - exp(linspace(log(1/4), log(1/512), heads)) — plain Python floats."""
    lo, hi = math.log(1.0 / 4.0), math.log(1.0 / 512.0)
    if heads == 1:
        ts = [lo]
    else:
        ts = [lo + (hi - lo) * i / (heads - 1) for i in range(heads)]
    return [1.0 - math.exp(t) for t in ts]


def _xpos_tables(seq_len, head_dim, scale_base=512.0):
    """XPOS cos/sin tables (scale already folded in): (S, head_dim) each."""
    half = head_dim // 2
    base = (jnp.arange(0, head_dim, 2, dtype=jnp.float32) + 0.4 * head_dim) / (1.4 * head_dim)
    pos = jnp.arange(seq_len, dtype=jnp.float32)
    scale = base[None, :] ** (pos[:, None] / scale_base)                     # (S, half)
    inv_freq = 1.0 / (10000.0 ** (jnp.arange(half, dtype=jnp.float32) / half))
    sinusoid = pos[:, None] * inv_freq[None, :]                              # (S, half)
    sin, cos = jnp.sin(sinusoid), jnp.cos(sinusoid)
    dup = lambda m: jnp.repeat(m, 2, axis=1)                                 # duplicate_interleave
    return dup(cos * scale), dup(sin * scale), dup(cos / scale), dup(sin / scale)


def _rot2_ref(x):
    """rotate_every_two: out[..., 2k] = -x[..., 2k+1]; out[..., 2k+1] = x[..., 2k]."""
    x1 = x[..., 0::2]
    x2 = x[..., 1::2]
    return jnp.stack((-x2, x1), axis=-1).reshape(x.shape)


# ------------------------------ Pallas kernel ---------------------------------

def msr_kernel(qi_s_ref, ki_s_ref,               # SMEM: flattened triangular (qi, ki) schedule
               qx_ref, kx_ref,                   # (blk, heads*hsp) bf16 — XPOS'ed Q / K tiles
               v_ref, g_ref,                     # (blk, heads*hvp) bf16 — V tile / swish-gate tile
               wo_ref,                           # (heads*hvp, Hp)  bf16
               gnw_ref, gnb_ref,                 # (1, heads*hvp)   f32
               out_ref,                          # (blk, Hp)        bf16
               acc_scr,                          # (blk, heads*hvp) f32 VMEM accumulator
               *, heads, hsp, hvp, hv_real, loggam, eps, blk):
    t = pl.program_id(1)
    qi = qi_s_ref[t]
    ki = ki_s_ref[t]

    # --- new Q tile: zero the accumulator ----------------------------------------------------
    @pl.when(ki == 0)
    def _init():
        acc_scr[...] = jnp.zeros_like(acc_scr)

    # --- interior tiles (ki < qi): fully causal, decay folded into the matmul operands -------
    @pl.when(ki < qi)
    def _interior():
        r = lax.broadcasted_iota(jnp.int32, (blk, 1), 0).astype(jnp.float32)   # query row in tile
        c = lax.broadcasted_iota(jnp.int32, (blk, 1), 0).astype(jnp.float32)   # key row in tile
        base = ((qi - ki) * blk).astype(jnp.float32)                           # >= blk
        for h in range(heads):                                                 # small static unroll
            # gamma^(n-m) = exp(r*logg) * exp((base-c)*logg); both exponents <= 0 here, so no
            # overflow; far-away underflow to 0 only kills already-negligible contributions.
            qsc = jnp.exp(r * loggam[h])                                       # (blk, 1) f32
            ksc = jnp.exp((base - c) * loggam[h])                              # (blk, 1) f32
            qh = (qx_ref[:, pl.ds(h * hsp, hsp)] * qsc).astype(jnp.bfloat16)
            kh = (kx_ref[:, pl.ds(h * hsp, hsp)] * ksc).astype(jnp.bfloat16)
            ret = lax.dot_general(qh, kh, (((1,), (1,)), ((), ())),
                                  preferred_element_type=jnp.float32)
            vh = v_ref[:, pl.ds(h * hvp, hvp)]
            acc_scr[:, pl.ds(h * hvp, hvp)] += jnp.dot(
                ret.astype(jnp.bfloat16), vh, preferred_element_type=jnp.float32)

    # --- diagonal tile (ki == qi): exact masked decay, then finalize this Q tile --------------
    @pl.when(ki == qi)
    def _diag_and_finalize():
        rr = lax.broadcasted_iota(jnp.int32, (blk, blk), 0)
        cc = lax.broadcasted_iota(jnp.int32, (blk, blk), 1)
        causal = rr >= cc
        dist = jnp.where(causal, (rr - cc).astype(jnp.float32), 0.0)           # mask BEFORE exp
        for h in range(heads):
            dec = jnp.where(causal, jnp.exp(dist * loggam[h]), 0.0)
            qh = qx_ref[:, pl.ds(h * hsp, hsp)]
            kh = kx_ref[:, pl.ds(h * hsp, hsp)]
            ret = lax.dot_general(qh, kh, (((1,), (1,)), ((), ())),
                                  preferred_element_type=jnp.float32) * dec
            vh = v_ref[:, pl.ds(h * hvp, hvp)]
            acc_scr[:, pl.ds(h * hvp, hvp)] += jnp.dot(
                ret.astype(jnp.bfloat16), vh, preferred_element_type=jnp.float32)

        # GroupNorm per head: centered variance, padded lanes masked out (runs once per Q tile).
        inv = 1.0 / hv_real
        lane_ok = lax.broadcasted_iota(jnp.int32, (1, hvp), 1) < hv_real       # hoisted
        for h in range(heads):
            sl = pl.ds(h * hvp, hvp)
            yh = acc_scr[:, sl]                                                # (blk, hvp) f32
            mu = jnp.sum(yh, axis=-1, keepdims=True) * inv                     # padded lanes == 0
            d = jnp.where(lane_ok, yh - mu, 0.0)
            var = jnp.sum(d * d, axis=-1, keepdims=True) * inv
            acc_scr[:, sl] = d * lax.rsqrt(var + eps)

        # affine, precomputed swish gate, fused output projection, bf16 writeback
        y = acc_scr[...] * gnw_ref[...] + gnb_ref[...]
        gy = (g_ref[...].astype(jnp.float32) * y).astype(jnp.bfloat16)
        out_ref[...] = jnp.dot(gy, wo_ref[...],
                               preferred_element_type=jnp.float32).astype(out_ref.dtype)


# ------------------------------ wrapper / glue ---------------------------------

def multi_scale_retention(x, params, *, block=256):
    """x: (B, S, H_in) float32; params: logical (unpadded, torch-shaped) parameters."""
    B, S, H = x.shape
    wq, wk, wv = params["wq"], params["wk"], params["wv"]           # (heads, H, hs/hv)
    wg, wo = params["wg"], params["wo"]                             # (H, v_dim), (v_dim, H)
    gn_w, gn_b = params["gn_w"], params["gn_b"]                     # (v_dim,)
    heads, _, hs = wq.shape
    hv = wv.shape[-1]

    # padded / fused geometry (lane-dense: feature dims -> multiples of 128)
    Hp = _round_up(H, 128)
    hsp = _round_up(hs, 128)
    hvp = _round_up(hv, 128)
    hid_p = heads * hsp
    vdim_p = heads * hvp
    blk = min(block, _round_up(S, 8))
    Sp = _round_up(S, blk)
    nq = Sp // blk

    f32, bf16 = jnp.float32, jnp.bfloat16

    # ---- once-per-token precompute in plain XLA (no redundancy, keeps the kernel MXU-bound):
    #      qx = xpos(X @ W_Q), kx = xpos_down(X @ W_K), v = X @ W_V, gate = swish(X @ W_G)
    cq, sq, ck, sk = _xpos_tables(S, hs)                            # (S, hs) each
    q = jnp.einsum("bsh,nhd->bsnd", x, wq)                          # (B, S, heads, hs)
    k = jnp.einsum("bsh,nhd->bsnd", x, wk)
    v = jnp.einsum("bsh,nhd->bsnd", x, wv)                          # (B, S, heads, hv)
    qx = q * cq[None, :, None, :] + _rot2_ref(q) * sq[None, :, None, :]
    kx = k * ck[None, :, None, :] + _rot2_ref(k) * sk[None, :, None, :]
    g = x @ wg
    g = (g * jax.nn.sigmoid(g)).reshape(B, S, heads, hv)

    def pack(t, dp):                        # (B, S, heads, d) -> (B, Sp, heads*dp) bf16, zero pad
        d = t.shape[-1]
        t = jnp.pad(t, ((0, 0), (0, Sp - S), (0, 0), (0, dp - d)))
        return t.reshape(B, Sp, heads * dp).astype(bf16)

    qx_p = pack(qx, hsp)
    kx_p = pack(kx, hsp)
    v_p = pack(v, hvp)
    g_p = pack(g, hvp)

    # output projection & group-norm params in the padded head-blocked layout
    wo_p = jnp.pad(wo.reshape(heads, hv, H),
                   ((0, 0), (0, hvp - hv), (0, Hp - H))).reshape(vdim_p, Hp).astype(bf16)
    gnw_p = jnp.pad(gn_w.reshape(heads, hv), ((0, 0), (0, hvp - hv))).reshape(1, vdim_p).astype(f32)
    gnb_p = jnp.pad(gn_b.reshape(heads, hv), ((0, 0), (0, hvp - hv))).reshape(1, vdim_p).astype(f32)

    # ---- flattened lower-triangular (qi, ki) schedule: no dead grid steps --------------------
    qi_l, ki_l = [], []
    for qq in range(nq):
        for kk in range(qq + 1):
            qi_l.append(qq)
            ki_l.append(kk)
    qi_sched = jnp.asarray(qi_l, jnp.int32)
    ki_sched = jnp.asarray(ki_l, jnp.int32)
    n_tri = len(qi_l)

    loggam = tuple(math.log(gm) for gm in _gammas(heads))           # compile-time constants

    kernel = functools.partial(msr_kernel, heads=heads, hsp=hsp, hvp=hvp,
                               hv_real=hv, loggam=loggam, eps=1e-5, blk=blk)

    grid_spec = pltpu.PrefetchScalarGridSpec(
        num_scalar_prefetch=2,
        grid=(B, n_tri),
        in_specs=[
            pl.BlockSpec((None, blk, hid_p), lambda b, t, qs, ks: (b, qs[t], 0)),    # qx tile
            pl.BlockSpec((None, blk, hid_p), lambda b, t, qs, ks: (b, ks[t], 0)),    # kx tile
            pl.BlockSpec((None, blk, vdim_p), lambda b, t, qs, ks: (b, ks[t], 0)),   # v tile
            pl.BlockSpec((None, blk, vdim_p), lambda b, t, qs, ks: (b, qs[t], 0)),   # gate tile
            pl.BlockSpec((vdim_p, Hp), lambda b, t, qs, ks: (0, 0)),                 # W_O
            pl.BlockSpec((1, vdim_p), lambda b, t, qs, ks: (0, 0)),                  # GN weight
            pl.BlockSpec((1, vdim_p), lambda b, t, qs, ks: (0, 0)),                  # GN bias
        ],
        out_specs=pl.BlockSpec((None, blk, Hp), lambda b, t, qs, ks: (b, qs[t], 0)),
        scratch_shapes=[pltpu.VMEM((blk, vdim_p), f32)],             # Y accumulator
    )

    out = pl.pallas_call(
        kernel,
        grid_spec=grid_spec,
        out_shape=jax.ShapeDtypeStruct((B, Sp, Hp), bf16),
        compiler_params=pltpu.CompilerParams(
            dimension_semantics=("parallel", "arbitrary")),
    )(qi_sched, ki_sched, qx_p, kx_p, v_p, g_p, wo_p, gnw_p, gnb_p)

    # kernel writeback stays bf16; final f32 cast is only interface parity with the torch module
    return out[:, :S, :H].astype(jnp.float32)


# ------------------------------ parameters & reference --------------------------

def init_params(key, input_size, hidden_size, heads, double_v_dim=False):
    head_size = hidden_size // heads
    head_v = head_size * 2 if double_v_dim else head_size
    v_dim = heads * head_v
    kq, kk, kv, kg, ko = jax.random.split(key, 5)
    wq = jax.random.normal(kq, (heads, input_size, head_size), jnp.float32) / input_size
    wk = jax.random.normal(kk, (heads, input_size, head_size), jnp.float32) / input_size
    wv = jax.random.normal(kv, (heads, input_size, head_v), jnp.float32) / input_size
    wg = jax.random.normal(kg, (input_size, v_dim), jnp.float32) / input_size
    wo = jax.random.normal(ko, (v_dim, input_size), jnp.float32) / input_size
    return dict(wq=wq, wk=wk, wv=wv, wg=wg, wo=wo,
                gn_w=jnp.ones((v_dim,), jnp.float32),      # nn.GroupNorm affine (init: 1, 0)
                gn_b=jnp.zeros((v_dim,), jnp.float32))


def msr_reference(x, params, eps=1e-5):
    """Pure-JAX f32 reference, faithful to the PyTorch MultiScaleRetention forward."""
    wq, wk, wv = params["wq"], params["wk"], params["wv"]
    wg, wo = params["wg"], params["wo"]
    gn_w, gn_b = params["gn_w"], params["gn_b"]
    heads, _, hs = wq.shape
    B, S, _ = x.shape
    cq, sq, ck, sk = _xpos_tables(S, hs)
    gammas = _gammas(heads)
    n = jnp.arange(S)[:, None]
    m = jnp.arange(S)[None, :]
    dist = (n - m).astype(jnp.float32)
    ys = []
    for h in range(heads):
        q = x @ wq[h]
        k = x @ wk[h]
        v = x @ wv[h]
        qx = q * cq + _rot2_ref(q) * sq
        kx = k * ck + _rot2_ref(k) * sk
        D = jnp.where(n >= m, jnp.float32(gammas[h]) ** jnp.where(n >= m, dist, 0.0), 0.0)
        ret = jnp.einsum("bsd,btd->bst", qx, kx) * D[None]
        ys.append(ret @ v)
    y = jnp.concatenate(ys, axis=-1)                                  # (B, S, v_dim)
    yg = y.reshape(B, S, heads, -1)
    mu = yg.mean(-1, keepdims=True)
    var = ((yg - mu) ** 2).mean(-1, keepdims=True)
    yn = ((yg - mu) / jnp.sqrt(var + eps)).reshape(B, S, -1) * gn_w + gn_b
    g = x @ wg
    g = g * jax.nn.sigmoid(g)
    return (g * yn) @ wo


# ------------------------------------ main --------------------------------------

if __name__ == "__main__":
    key = jax.random.PRNGKey(0)
    k1x, k1p, k2x, k2p = jax.random.split(key, 4)

    # test 1: single-tile case (diagonal-only path)
    B, S, input_size, hidden_size, heads = 2, 8, 16, 16, 2
    x1 = jax.random.normal(k1x, (B, S, input_size), jnp.float32)
    p1 = init_params(k1p, input_size, hidden_size, heads)
    out1 = jax.block_until_ready(multi_scale_retention(x1, p1))
    ref1 = msr_reference(x1, p1)
    assert out1.shape == (B, S, input_size)
    assert jnp.allclose(out1, ref1, rtol=2e-2, atol=1e-2), (
        f"test1 mismatch: max |err| = {float(jnp.max(jnp.abs(out1 - ref1)))}")

    # test 2: multi-tile case (triangular schedule + interior decay-folding path, double_v_dim)
    B2, S2, in2, hid2, heads2 = 2, 32, 16, 32, 2
    x2 = jax.random.normal(k2x, (B2, S2, in2), jnp.float32)
    p2 = init_params(k2p, in2, hid2, heads2, double_v_dim=True)
    out2 = jax.block_until_ready(multi_scale_retention(x2, p2, block=8))
    ref2 = msr_reference(x2, p2)
    assert out2.shape == (B2, S2, in2)
    assert jnp.allclose(out2, ref2, rtol=2e-2, atol=1e-2), (
        f"test2 mismatch: max |err| = {float(jnp.max(jnp.abs(out2 - ref2)))}")

    print("KERNEL_OK")
</pallas_src>

<mosaic_0001>
module attributes {stable_mosaic.version = 11 : i64} {
  func.func @msr_kernel(%arg0: i32, %arg1: i32, %arg2: memref<1xi32, #tpu.memory_space<smem>>, %arg3: memref<1xi32, #tpu.memory_space<smem>>, %arg4: memref<1x8x256xbf16, #tpu.memory_space<vmem>>, %arg5: memref<1x8x256xbf16, #tpu.memory_space<vmem>>, %arg6: memref<1x8x256xbf16, #tpu.memory_space<vmem>>, %arg7: memref<1x8x256xbf16, #tpu.memory_space<vmem>>, %arg8: memref<256x128xbf16, #tpu.memory_space<vmem>>, %arg9: memref<1x256xf32, #tpu.memory_space<vmem>>, %arg10: memref<1x256xf32, #tpu.memory_space<vmem>>, %arg11: memref<1x8x128xbf16, #tpu.memory_space<vmem>>, %arg12: memref<8x256xf32, #tpu.memory_space<vmem>>) attributes {dimension_semantics = [#tpu.dimension_semantics<parallel>, #tpu.dimension_semantics<arbitrary>], iteration_bounds = array<i64: 2, 1>, scalar_prefetch = 2 : i64, scratch_operands = 1 : i64, tpu.core_type = #tpu.core_type<tc>, window_params = [{transform_indices = @transform_0, window_bounds = array<i64: 1, 8, 256>}, {transform_indices = @transform_1, window_bounds = array<i64: 1, 8, 256>}, {transform_indices = @transform_2, window_bounds = array<i64: 1, 8, 256>}, {transform_indices = @transform_3, window_bounds = array<i64: 1, 8, 256>}, {pipeline_mode = #tpu.pipeline_mode<synchronous>, transform_indices = @transform_4, window_bounds = array<i64: 256, 128>}, {pipeline_mode = #tpu.pipeline_mode<synchronous>, transform_indices = @transform_5, window_bounds = array<i64: 1, 256>}, {pipeline_mode = #tpu.pipeline_mode<synchronous>, transform_indices = @transform_6, window_bounds = array<i64: 1, 256>}, {transform_indices = @transform_7, window_bounds = array<i64: 1, 8, 128>}]} {
    %0 = arith.index_cast %arg1 : i32 to index
    %1 = memref.load %arg2[%0] : memref<1xi32, #tpu.memory_space<smem>>
    %2 = arith.index_cast %arg1 : i32 to index
    %3 = memref.load %arg3[%2] : memref<1xi32, #tpu.memory_space<smem>>
    %c0_i32 = arith.constant 0 : i32
    %4 = arith.cmpi eq, %3, %c0_i32 : i32
    %5 = arith.extui %4 : i1 to i32
    %c0_i32_0 = arith.constant 0 : i32
    %6 = arith.cmpi ne, %5, %c0_i32_0 : i32
    scf.if %6 {
      %cst = arith.constant 0.000000e+00 : f32
      %13 = vector.broadcast %cst : f32 to vector<8x256xf32>
      %c0 = arith.constant 0 : index
      %c0_3 = arith.constant 0 : index
      %14 = vector.load %arg12[%c0, %c0_3] : memref<8x256xf32, #tpu.memory_space<vmem>>, vector<8x256xf32>
      tpu.vector_store %arg12[%c0, %c0_3], %13 {strides = array<i32>} : memref<8x256xf32, #tpu.memory_space<vmem>>, vector<8x256xf32>,
    } else {
    }
    %7 = arith.cmpi slt, %3, %1 : i32
    %8 = arith.extui %7 : i1 to i32
    %c0_i32_1 = arith.constant 0 : i32
    %9 = arith.cmpi ne, %8, %c0_i32_1 : i32
    scf.if %9 {
      %13 = tpu.iota {dimensions = array<i32: 0>} : vector<8x1xi32>
      %14 = arith.sitofp %13 : vector<8x1xi32> to vector<8x1xf32>
      %15 = tpu.iota {dimensions = array<i32: 0>} : vector<8x1xi32>
      %16 = arith.sitofp %15 : vector<8x1xi32> to vector<8x1xf32>
      %17 = arith.subi %1, %3 : i32
      %c8_i32 = arith.constant 8 : i32
      %18 = arith.muli %17, %c8_i32 : i32
      %19 = arith.sitofp %18 : i32 to f32
      %cst = arith.constant -0.287682086 : f32
      %20 = vector.broadcast %cst : f32 to vector<8x1xf32>
      %21 = arith.mulf %14, %20 : vector<8x1xf32>
      %22 = math.exp %21 : vector<8x1xf32>
      %23 = vector.broadcast %19 : f32 to vector<8x1xf32>
      %24 = arith.subf %23, %16 : vector<8x1xf32>
      %cst_3 = arith.constant -0.287682086 : f32
      %25 = vector.broadcast %cst_3 : f32 to vector<8x1xf32>
      %26 = arith.mulf %24, %25 : vector<8x1xf32>
      %27 = math.exp %26 : vector<8x1xf32>
      %c0 = arith.constant 0 : index
      %c0_4 = arith.constant 0 : index
      %c0_5 = arith.constant 0 : index
      %28 = vector.load %arg4[%c0, %c0_4, %c0_5] : memref<1x8x256xbf16, #tpu.memory_space<vmem>>, vector<1x8x128xbf16>
      %29 = vector.shape_cast %28 : vector<1x8x128xbf16> to vector<8x128xbf16>
      %30 = arith.extf %29 : vector<8x128xbf16> to vector<8x128xf32>
      %31 = vector.broadcast %22 : vector<8x1xf32> to vector<8x128xf32>
      %32 = arith.mulf %30, %31 : vector<8x128xf32>
      %33 = arith.truncf %32 : vector<8x128xf32> to vector<8x128xbf16>
      %c0_6 = arith.constant 0 : index
      %c0_7 = arith.constant 0 : index
      %c0_8 = arith.constant 0 : index
      %34 = vector.load %arg5[%c0_6, %c0_7, %c0_8] : memref<1x8x256xbf16, #tpu.memory_space<vmem>>, vector<1x8x128xbf16>
      %35 = vector.shape_cast %34 : vector<1x8x128xbf16> to vector<8x128xbf16>
      %36 = arith.extf %35 : vector<8x128xbf16> to vector<8x128xf32>
      %37 = vector.broadcast %27 : vector<8x1xf32> to vector<8x128xf32>
      %38 = arith.mulf %36, %37 : vector<8x128xf32>
      %39 = arith.truncf %38 : vector<8x128xf32> to vector<8x128xbf16>
      %cst_9 = arith.constant dense<0.000000e+00> : vector<8x8xf32>
      %40 = tpu.matmul %33, %39, %cst_9 {dimension_numbers = #tpu.dot_dimension_numbers<[1], [1], [0], [0], [0, 0, 1, 0], [], []>} : vector<8x128xbf16>, vector<8x128xbf16>, vector<8x8xf32> -> vector<8x8xf32>
      %c0_10 = arith.constant 0 : index
      %c0_11 = arith.constant 0 : index
      %c0_12 = arith.constant 0 : index
      %41 = vector.load %arg6[%c0_10, %c0_11, %c0_12] : memref<1x8x256xbf16, #tpu.memory_space<vmem>>, vector<1x8x128xbf16>
      %42 = vector.shape_cast %41 : vector<1x8x128xbf16> to vector<8x128xbf16>
      %c0_13 = arith.constant 0 : index
      %c0_14 = arith.constant 0 : index
      %43 = vector.load %arg12[%c0_13, %c0_14] : memref<8x256xf32, #tpu.memory_space<vmem>>, vector<8x128xf32>
      %44 = arith.truncf %40 : vector<8x8xf32> to vector<8x8xbf16>
      %cst_15 = arith.constant dense<0.000000e+00> : vector<8x128xf32>
      %45 = tpu.matmul %44, %42, %cst_15 {dimension_numbers = #tpu.dot_dimension_numbers<[1], [0], [0], [1], [0, 0, 1, 1], [], []>} : vector<8x8xbf16>, vector<8x128xbf16>, vector<8x128xf32> -> vector<8x128xf32>
      %46 = arith.addf %43, %45 : vector<8x128xf32>
      %c0_16 = arith.constant 0 : index
      %c0_17 = arith.constant 0 : index
      %47 = vector.load %arg12[%c0_16, %c0_17] : memref<8x256xf32, #tpu.memory_space<vmem>>, vector<8x128xf32>
      tpu.vector_store %arg12[%c0_16, %c0_17], %46 {strides = array<i32>} : memref<8x256xf32, #tpu.memory_space<vmem>>, vector<8x128xf32>,
      %cst_18 = arith.constant -0.00195503491 : f32
      %48 = vector.broadcast %cst_18 : f32 to vector<8x1xf32>
      %49 = arith.mulf %14, %48 : vector<8x1xf32>
      %50 = math.exp %49 : vector<8x1xf32>
      %51 = vector.broadcast %19 : f32 to vector<8x1xf32>
      %52 = arith.subf %51, %16 : vector<8x1xf32>
      %cst_19 = arith.constant -0.00195503491 : f32
      %53 = vector.broadcast %cst_19 : f32 to vector<8x1xf32>
      %54 = arith.mulf %52, %53 : vector<8x1xf32>
      %55 = math.exp %54 : vector<8x1xf32>
      %c0_20 = arith.constant 0 : index
      %c0_21 = arith.constant 0 : index
      %c128 = arith.constant 128 : index
      %56 = vector.load %arg4[%c0_20, %c0_21, %c128] : memref<1x8x256xbf16, #tpu.memory_space<vmem>>, vector<1x8x128xbf16>
      %57 = vector.shape_cast %56 : vector<1x8x128xbf16> to vector<8x128xbf16>
      %58 = arith.extf %57 : vector<8x128xbf16> to vector<8x128xf32>
      %59 = vector.broadcast %50 : vector<8x1xf32> to vector<8x128xf32>
      %60 = arith.mulf %58, %59 : vector<8x128xf32>
      %61 = arith.truncf %60 : vector<8x128xf32> to vector<8x128xbf16>
      %c0_22 = arith.constant 0 : index
      %c0_23 = arith.constant 0 : index
      %c128_24 = arith.constant 128 : index
      %62 = vector.load %arg5[%c0_22, %c0_23, %c128_24] : memref<1x8x256xbf16, #tpu.memory_space<vmem>>, vector<1x8x128xbf16>
      %63 = vector.shape_cast %62 : vector<1x8x128xbf16> to vector<8x128xbf16>
      %64 = arith.extf %63 : vector<8x128xbf16> to vector<8x128xf32>
      %65 = vector.broadcast %55 : vector<8x1xf32> to vector<8x128xf32>
      %66 = arith.mulf %64, %65 : vector<8x128xf32>
      %67 = arith.truncf %66 : vector<8x128xf32> to vector<8x128xbf16>
      %cst_25 = arith.constant dense<0.000000e+00> : vector<8x8xf32>
      %68 = tpu.matmul %61, %67, %cst_25 {dimension_numbers = #tpu.dot_dimension_numbers<[1], [1], [0], [0], [0, 0, 1, 0], [], []>} : vector<8x128xbf16>, vector<8x128xbf16>, vector<8x8xf32> -> vector<8x8xf32>
      %c0_26 = arith.constant 0 : index
      %c0_27 = arith.constant 0 : index
      %c128_28 = arith.constant 128 : index
      %69 = vector.load %arg6[%c0_26, %c0_27, %c128_28] : memref<1x8x256xbf16, #tpu.memory_space<vmem>>, vector<1x8x128xbf16>
      %70 = vector.shape_cast %69 : vector<1x8x128xbf16> to vector<8x128xbf16>
      %c0_29 = arith.constant 0 : index
      %c128_30 = arith.constant 128 : index
      %71 = vector.load %arg12[%c0_29, %c128_30] : memref<8x256xf32, #tpu.memory_space<vmem>>, vector<8x128xf32>
      %72 = arith.truncf %68 : vector<8x8xf32> to vector<8x8xbf16>
      %cst_31 = arith.constant dense<0.000000e+00> : vector<8x128xf32>
      %73 = tpu.matmul %72, %70, %cst_31 {dimension_numbers = #tpu.dot_dimension_numbers<[1], [0], [0], [1], [0, 0, 1, 1], [], []>} : vector<8x8xbf16>, vector<8x128xbf16>, vector<8x128xf32> -> vector<8x128xf32>
      %74 = arith.addf %71, %73 : vector<8x128xf32>
      %c0_32 = arith.constant 0 : index
      %c128_33 = arith.constant 128 : index
      %75 = vector.load %arg12[%c0_32, %c128_33] : memref<8x256xf32, #tpu.memory_space<vmem>>, vector<8x128xf32>
      tpu.vector_store %arg12[%c0_32, %c128_33], %74 {strides = array<i32>} : memref<8x256xf32, #tpu.memory_space<vmem>>, vector<8x128xf32>,
    } else {
    }
    %10 = arith.cmpi eq, %3, %1 : i32
    %11 = arith.extui %10 : i1 to i32
    %c0_i32_2 = arith.constant 0 : i32
    %12 = arith.cmpi ne, %11, %c0_i32_2 : i32
    scf.if %12 {
      %13 = tpu.iota {dimensions = array<i32: 0>} : vector<8x8xi32>
      %14 = tpu.iota {dimensions = array<i32: 1>} : vector<8x8xi32>
      %15 = arith.cmpi sge, %13, %14 : vector<8x8xi32>
      %16 = arith.subi %13, %14 : vector<8x8xi32>
      %17 = arith.sitofp %16 : vector<8x8xi32> to vector<8x8xf32>
      %cst = arith.constant 0.000000e+00 : f32
      %18 = vector.broadcast %cst : f32 to vector<8x8xf32>
      %19 = arith.select %15, %17, %18 : vector<8x8xi1>, vector<8x8xf32>
      %cst_3 = arith.constant -0.287682086 : f32
      %20 = vector.broadcast %cst_3 : f32 to vector<8x8xf32>
      %21 = arith.mulf %19, %20 : vector<8x8xf32>
      %22 = math.exp %21 : vector<8x8xf32>
      %cst_4 = arith.constant 0.000000e+00 : f32
      %23 = vector.broadcast %cst_4 : f32 to vector<8x8xf32>
      %24 = arith.select %15, %22, %23 : vector<8x8xi1>, vector<8x8xf32>
      %c0 = arith.constant 0 : index
      %c0_5 = arith.constant 0 : index
      %c0_6 = arith.constant 0 : index
      %25 = vector.load %arg4[%c0, %c0_5, %c0_6] : memref<1x8x256xbf16, #tpu.memory_space<vmem>>, vector<1x8x128xbf16>
      %26 = vector.shape_cast %25 : vector<1x8x128xbf16> to vector<8x128xbf16>
      %c0_7 = arith.constant 0 : index
      %c0_8 = arith.constant 0 : index
      %c0_9 = arith.constant 0 : index
      %27 = vector.load %arg5[%c0_7, %c0_8, %c0_9] : memref<1x8x256xbf16, #tpu.memory_space<vmem>>, vector<1x8x128xbf16>
      %28 = vector.shape_cast %27 : vector<1x8x128xbf16> to vector<8x128xbf16>
      %cst_10 = arith.constant dense<0.000000e+00> : vector<8x8xf32>
      %29 = tpu.matmul %26, %28, %cst_10 {dimension_numbers = #tpu.dot_dimension_numbers<[1], [1], [0], [0], [0, 0, 1, 0], [], []>} : vector<8x128xbf16>, vector<8x128xbf16>, vector<8x8xf32> -> vector<8x8xf32>
      %30 = arith.mulf %29, %24 : vector<8x8xf32>
      %c0_11 = arith.constant 0 : index
      %c0_12 = arith.constant 0 : index
      %c0_13 = arith.constant 0 : index
      %31 = vector.load %arg6[%c0_11, %c0_12, %c0_13] : memref<1x8x256xbf16, #tpu.memory_space<vmem>>, vector<1x8x128xbf16>
      %32 = vector.shape_cast %31 : vector<1x8x128xbf16> to vector<8x128xbf16>
      %c0_14 = arith.constant 0 : index
      %c0_15 = arith.constant 0 : index
      %33 = vector.load %arg12[%c0_14, %c0_15] : memref<8x256xf32, #tpu.memory_space<vmem>>, vector<8x128xf32>
      %34 = arith.truncf %30 : vector<8x8xf32> to vector<8x8xbf16>
      %cst_16 = arith.constant dense<0.000000e+00> : vector<8x128xf32>
      %35 = tpu.matmul %34, %32, %cst_16 {dimension_numbers = #tpu.dot_dimension_numbers<[1], [0], [0], [1], [0, 0, 1, 1], [], []>} : vector<8x8xbf16>, vector<8x128xbf16>, vector<8x128xf32> -> vector<8x128xf32>
      %36 = arith.addf %33, %35 : vector<8x128xf32>
      %c0_17 = arith.constant 0 : index
      %c0_18 = arith.constant 0 : index
      %37 = vector.load %arg12[%c0_17, %c0_18] : memref<8x256xf32, #tpu.memory_space<vmem>>, vector<8x128xf32>
      tpu.vector_store %arg12[%c0_17, %c0_18], %36 {strides = array<i32>} : memref<8x256xf32, #tpu.memory_space<vmem>>, vector<8x128xf32>,
      %cst_19 = arith.constant -0.00195503491 : f32
      %38 = vector.broadcast %cst_19 : f32 to vector<8x8xf32>
      %39 = arith.mulf %19, %38 : vector<8x8xf32>
      %40 = math.exp %39 : vector<8x8xf32>
      %cst_20 = arith.constant 0.000000e+00 : f32
      %41 = vector.broadcast %cst_20 : f32 to vector<8x8xf32>
      %42 = arith.select %15, %40, %41 : vector<8x8xi1>, vector<8x8xf32>
      %c0_21 = arith.constant 0 : index
      %c0_22 = arith.constant 0 : index
      %c128 = arith.constant 128 : index
      %43 = vector.load %arg4[%c0_21, %c0_22, %c128] : memref<1x8x256xbf16, #tpu.memory_space<vmem>>, vector<1x8x128xbf16>
      %44 = vector.shape_cast %43 : vector<1x8x128xbf16> to vector<8x128xbf16>
      %c0_23 = arith.constant 0 : index
      %c0_24 = arith.constant 0 : index
      %c128_25 = arith.constant 128 : index
      %45 = vector.load %arg5[%c0_23, %c0_24, %c128_25] : memref<1x8x256xbf16, #tpu.memory_space<vmem>>, vector<1x8x128xbf16>
      %46 = vector.shape_cast %45 : vector<1x8x128xbf16> to vector<8x128xbf16>
      %cst_26 = arith.constant dense<0.000000e+00> : vector<8x8xf32>
      %47 = tpu.matmul %44, %46, %cst_26 {dimension_numbers = #tpu.dot_dimension_numbers<[1], [1], [0], [0], [0, 0, 1, 0], [], []>} : vector<8x128xbf16>, vector<8x128xbf16>, vector<8x8xf32> -> vector<8x8xf32>
      %48 = arith.mulf %47, %42 : vector<8x8xf32>
      %c0_27 = arith.constant 0 : index
      %c0_28 = arith.constant 0 : index
      %c128_29 = arith.constant 128 : index
      %49 = vector.load %arg6[%c0_27, %c0_28, %c128_29] : memref<1x8x256xbf16, #tpu.memory_space<vmem>>, vector<1x8x128xbf16>
      %50 = vector.shape_cast %49 : vector<1x8x128xbf16> to vector<8x128xbf16>
      %c0_30 = arith.constant 0 : index
      %c128_31 = arith.constant 128 : index
      %51 = vector.load %arg12[%c0_30, %c128_31] : memref<8x256xf32, #tpu.memory_space<vmem>>, vector<8x128xf32>
      %52 = arith.truncf %48 : vector<8x8xf32> to vector<8x8xbf16>
      %cst_32 = arith.constant dense<0.000000e+00> : vector<8x128xf32>
      %53 = tpu.matmul %52, %50, %cst_32 {dimension_numbers = #tpu.dot_dimension_numbers<[1], [0], [0], [1], [0, 0, 1, 1], [], []>} : vector<8x8xbf16>, vector<8x128xbf16>, vector<8x128xf32> -> vector<8x128xf32>
      %54 = arith.addf %51, %53 : vector<8x128xf32>
      %c0_33 = arith.constant 0 : index
      %c128_34 = arith.constant 128 : index
      %55 = vector.load %arg12[%c0_33, %c128_34] : memref<8x256xf32, #tpu.memory_space<vmem>>, vector<8x128xf32>
      tpu.vector_store %arg12[%c0_33, %c128_34], %54 {strides = array<i32>} : memref<8x256xf32, #tpu.memory_space<vmem>>, vector<8x128xf32>,
      %56 = tpu.iota {dimensions = array<i32: 1>} : vector<1x128xi32>
      %c8_i32 = arith.constant 8 : i32
      %57 = vector.broadcast %c8_i32 : i32 to vector<1x128xi32>
      %58 = arith.cmpi slt, %56, %57 : vector<1x128xi32>
      %c0_35 = arith.constant 0 : index
      %c0_36 = arith.constant 0 : index
      %59 = vector.load %arg12[%c0_35, %c0_36] : memref<8x256xf32, #tpu.memory_space<vmem>>, vector<8x128xf32>
      %cst_37 = arith.constant dense<0.000000e+00> : vector<8xf32>
      %60 = vector.multi_reduction <add>, %59, %cst_37 [1] : vector<8x128xf32> to vector<8xf32>
      %61 = vector.shape_cast %60 : vector<8xf32> to vector<8x1xf32>
      %cst_38 = arith.constant 1.250000e-01 : f32
      %62 = vector.broadcast %cst_38 : f32 to vector<8x1xf32>
      %63 = arith.mulf %61, %62 : vector<8x1xf32>
      %64 = vector.broadcast %63 : vector<8x1xf32> to vector<8x128xf32>
      %65 = arith.subf %59, %64 : vector<8x128xf32>
      %cst_39 = arith.constant 0.000000e+00 : f32
      %66 = vector.shape_cast %58 : vector<1x128xi1> to vector<1x128xi1>
      %67 = vector.broadcast %66 : vector<1x128xi1> to vector<8x128xi1>
      %68 = vector.broadcast %cst_39 : f32 to vector<8x128xf32>
      %69 = arith.select %67, %65, %68 : vector<8x128xi1>, vector<8x128xf32>
      %70 = arith.mulf %69, %69 : vector<8x128xf32>
      %cst_40 = arith.constant dense<0.000000e+00> : vector<8xf32>
      %71 = vector.multi_reduction <add>, %70, %cst_40 [1] : vector<8x128xf32> to vector<8xf32>
      %72 = vector.shape_cast %71 : vector<8xf32> to vector<8x1xf32>
      %cst_41 = arith.constant 1.250000e-01 : f32
      %73 = vector.broadcast %cst_41 : f32 to vector<8x1xf32>
      %74 = arith.mulf %72, %73 : vector<8x1xf32>
      %cst_42 = arith.constant 9.99999974E-6 : f32
      %75 = vector.broadcast %cst_42 : f32 to vector<8x1xf32>
      %76 = arith.addf %74, %75 : vector<8x1xf32>
      %77 = math.rsqrt %76 : vector<8x1xf32>
      %78 = vector.broadcast %77 : vector<8x1xf32> to vector<8x128xf32>
      %79 = arith.mulf %69, %78 : vector<8x128xf32>
      %c0_43 = arith.constant 0 : index
      %c0_44 = arith.constant 0 : index
      %80 = vector.load %arg12[%c0_43, %c0_44] : memref<8x256xf32, #tpu.memory_space<vmem>>, vector<8x128xf32>
      tpu.vector_store %arg12[%c0_43, %c0_44], %79 {strides = array<i32>} : memref<8x256xf32, #tpu.memory_space<vmem>>, vector<8x128xf32>,
      %c0_45 = arith.constant 0 : index
      %c128_46 = arith.constant 128 : index
      %81 = vector.load %arg12[%c0_45, %c128_46] : memref<8x256xf32, #tpu.memory_space<vmem>>, vector<8x128xf32>
      %cst_47 = arith.constant dense<0.000000e+00> : vector<8xf32>
      %82 = vector.multi_reduction <add>, %81, %cst_47 [1] : vector<8x128xf32> to vector<8xf32>
      %83 = vector.shape_cast %82 : vector<8xf32> to vector<8x1xf32>
      %cst_48 = arith.constant 1.250000e-01 : f32
      %84 = vector.broadcast %cst_48 : f32 to vector<8x1xf32>
      %85 = arith.mulf %83, %84 : vector<8x1xf32>
      %86 = vector.broadcast %85 : vector<8x1xf32> to vector<8x128xf32>
      %87 = arith.subf %81, %86 : vector<8x128xf32>
      %cst_49 = arith.constant 0.000000e+00 : f32
      %88 = vector.shape_cast %58 : vector<1x128xi1> to vector<1x128xi1>
      %89 = vector.broadcast %88 : vector<1x128xi1> to vector<8x128xi1>
      %90 = vector.broadcast %cst_49 : f32 to vector<8x128xf32>
      %91 = arith.select %89, %87, %90 : vector<8x128xi1>, vector<8x128xf32>
      %92 = arith.mulf %91, %91 : vector<8x128xf32>
      %cst_50 = arith.constant dense<0.000000e+00> : vector<8xf32>
      %93 = vector.multi_reduction <add>, %92, %cst_50 [1] : vector<8x128xf32> to vector<8xf32>
      %94 = vector.shape_cast %93 : vector<8xf32> to vector<8x1xf32>
      %cst_51 = arith.constant 1.250000e-01 : f32
      %95 = vector.broadcast %cst_51 : f32 to vector<8x1xf32>
      %96 = arith.mulf %94, %95 : vector<8x1xf32>
      %cst_52 = arith.constant 9.99999974E-6 : f32
      %97 = vector.broadcast %cst_52 : f32 to vector<8x1xf32>
      %98 = arith.addf %96, %97 : vector<8x1xf32>
      %99 = math.rsqrt %98 : vector<8x1xf32>
      %100 = vector.broadcast %99 : vector<8x1xf32> to vector<8x128xf32>
      %101 = arith.mulf %91, %100 : vector<8x128xf32>
      %c0_53 = arith.constant 0 : index
      %c128_54 = arith.constant 128 : index
      %102 = vector.load %arg12[%c0_53, %c128_54] : memref<8x256xf32, #tpu.memory_space<vmem>>, vector<8x128xf32>
      tpu.vector_store %arg12[%c0_53, %c128_54], %101 {strides = array<i32>} : memref<8x256xf32, #tpu.memory_space<vmem>>, vector<8x128xf32>,
      %c0_55 = arith.constant 0 : index
      %c0_56 = arith.constant 0 : index
      %103 = vector.load %arg12[%c0_55, %c0_56] : memref<8x256xf32, #tpu.memory_space<vmem>>, vector<8x256xf32>
      %c0_57 = arith.constant 0 : index
      %c0_58 = arith.constant 0 : index
      %104 = vector.load %arg9[%c0_57, %c0_58] : memref<1x256xf32, #tpu.memory_space<vmem>>, vector<1x256xf32>
      %105 = vector.broadcast %104 : vector<1x256xf32> to vector<8x256xf32>
      %106 = arith.mulf %103, %105 : vector<8x256xf32>
      %c0_59 = arith.constant 0 : index
      %c0_60 = arith.constant 0 : index
      %107 = vector.load %arg10[%c0_59, %c0_60] : memref<1x256xf32, #tpu.memory_space<vmem>>, vector<1x256xf32>
      %108 = vector.broadcast %107 : vector<1x256xf32> to vector<8x256xf32>
      %109 = arith.addf %106, %108 : vector<8x256xf32>
      %c0_61 = arith.constant 0 : index
      %c0_62 = arith.constant 0 : index
      %c0_63 = arith.constant 0 : index
      %110 = vector.load %arg7[%c0_61, %c0_62, %c0_63] : memref<1x8x256xbf16, #tpu.memory_space<vmem>>, vector<1x8x256xbf16>
      %111 = vector.shape_cast %110 : vector<1x8x256xbf16> to vector<8x256xbf16>
      %112 = arith.extf %111 : vector<8x256xbf16> to vector<8x256xf32>
      %113 = arith.mulf %112, %109 : vector<8x256xf32>
      %114 = arith.truncf %113 : vector<8x256xf32> to vector<8x256xbf16>
      %c0_64 = arith.constant 0 : index
      %c0_65 = arith.constant 0 : index
      %115 = vector.load %arg8[%c0_64, %c0_65] : memref<256x128xbf16, #tpu.memory_space<vmem>>, vector<256x128xbf16>
      %cst_66 = arith.constant dense<0.000000e+00> : vector<8x128xf32>
      %116 = tpu.matmul %114, %115, %cst_66 {dimension_numbers = #tpu.dot_dimension_numbers<[1], [0], [0], [1], [0, 0, 1, 1], [], []>} : vector<8x256xbf16>, vector<256x128xbf16>, vector<8x128xf32> -> vector<8x128xf32>
      %117 = arith.truncf %116 : vector<8x128xf32> to vector<8x128xbf16>
      %c0_67 = arith.constant 0 : index
      %c0_68 = arith.constant 0 : index
      %c0_69 = arith.constant 0 : index
      %118 = vector.load %arg11[%c0_67, %c0_68, %c0_69] : memref<1x8x128xbf16, #tpu.memory_space<vmem>>, vector<1x8x128xbf16>
      %119 = vector.shape_cast %118 : vector<1x8x128xbf16> to vector<8x128xbf16>
      %120 = vector.shape_cast %117 : vector<8x128xbf16> to vector<1x8x128xbf16>
      tpu.vector_store %arg11[%c0_67, %c0_68, %c0_69], %120 {strides = array<i32>} : memref<1x8x128xbf16, #tpu.memory_space<vmem>>, vector<1x8x128xbf16>,
    } else {
    }
    return
  }
  func.func @transform_0(%arg0: i32, %arg1: i32, %arg2: memref<1xi32, #tpu.memory_space<smem>>, %arg3: memref<1xi32, #tpu.memory_space<smem>>) -> (i32, i32, i32) {
    %0 = arith.index_cast %arg1 : i32 to index
    %1 = memref.load %arg2[%0] : memref<1xi32, #tpu.memory_space<smem>>
    %c0_i32 = arith.constant 0 : i32
    %c0_i32_0 = arith.constant 0 : i32
    return %arg0, %1, %c0_i32 : i32, i32, i32
  }
  func.func @transform_1(%arg0: i32, %arg1: i32, %arg2: memref<1xi32, #tpu.memory_space<smem>>, %arg3: memref<1xi32, #tpu.memory_space<smem>>) -> (i32, i32, i32) {
    %0 = arith.index_cast %arg1 : i32 to index
    %1 = memref.load %arg3[%0] : memref<1xi32, #tpu.memory_space<smem>>
    %c0_i32 = arith.constant 0 : i32
    %c0_i32_0 = arith.constant 0 : i32
    return %arg0, %1, %c0_i32 : i32, i32, i32
  }
  func.func @transform_2(%arg0: i32, %arg1: i32, %arg2: memref<1xi32, #tpu.memory_space<smem>>, %arg3: memref<1xi32, #tpu.memory_space<smem>>) -> (i32, i32, i32) {
    %0 = arith.index_cast %arg1 : i32 to index
    %1 = memref.load %arg3[%0] : memref<1xi32, #tpu.memory_space<smem>>
    %c0_i32 = arith.constant 0 : i32
    %c0_i32_0 = arith.constant 0 : i32
    return %arg0, %1, %c0_i32 : i32, i32, i32
  }
  func.func @transform_3(%arg0: i32, %arg1: i32, %arg2: memref<1xi32, #tpu.memory_space<smem>>, %arg3: memref<1xi32, #tpu.memory_space<smem>>) -> (i32, i32, i32) {
    %0 = arith.index_cast %arg1 : i32 to index
    %1 = memref.load %arg2[%0] : memref<1xi32, #tpu.memory_space<smem>>
    %c0_i32 = arith.constant 0 : i32
    %c0_i32_0 = arith.constant 0 : i32
    return %arg0, %1, %c0_i32 : i32, i32, i32
  }
  func.func @transform_4(%arg0: i32, %arg1: i32, %arg2: memref<1xi32, #tpu.memory_space<smem>>, %arg3: memref<1xi32, #tpu.memory_space<smem>>) -> (i32, i32) {
    %c0_i32 = arith.constant 0 : i32
    %c0_i32_0 = arith.constant 0 : i32
    %c0_i32_1 = arith.constant 0 : i32
    return %c0_i32, %c0_i32_0 : i32, i32
  }
  func.func @transform_5(%arg0: i32, %arg1: i32, %arg2: memref<1xi32, #tpu.memory_space<smem>>, %arg3: memref<1xi32, #tpu.memory_space<smem>>) -> (i32, i32) {
    %c0_i32 = arith.constant 0 : i32
    %c0_i32_0 = arith.constant 0 : i32
    %c0_i32_1 = arith.constant 0 : i32
    return %c0_i32, %c0_i32_0 : i32, i32
  }
  func.func @transform_6(%arg0: i32, %arg1: i32, %arg2: memref<1xi32, #tpu.memory_space<smem>>, %arg3: memref<1xi32, #tpu.memory_space<smem>>) -> (i32, i32) {
    %c0_i32 = arith.constant 0 : i32
    %c0_i32_0 = arith.constant 0 : i32
    %c0_i32_1 = arith.constant 0 : i32
    return %c0_i32, %c0_i32_0 : i32, i32
  }
  func.func @transform_7(%arg0: i32, %arg1: i32, %arg2: memref<1xi32, #tpu.memory_space<smem>>, %arg3: memref<1xi32, #tpu.memory_space<smem>>) -> (i32, i32, i32) {
    %0 = arith.index_cast %arg1 : i32 to index
    %1 = memref.load %arg2[%0] : memref<1xi32, #tpu.memory_space<smem>>
    %c0_i32 = arith.constant 0 : i32
    %c0_i32_0 = arith.constant 0 : i32
    return %arg0, %1, %c0_i32 : i32, i32, i32
  }
}

</mosaic_0001>

<bundles_post_ra>
// kernel: tpu_custom_call.1
= control target key start
LH: loop header
LB: loop body
LE: loop exit
PB: predicated region body
PF: predicated region fallthrough
CT: control target
= control target key end

     0   :  { %s2352_s0 = inlined_call_operand.<no memory space> [shape: s32[1], index: 0, kind: input, shape index: {}]   ;;  %s2353_s1 = inlined_call_operand.<no memory space> [shape: s32[1], index: 1, kind: input, shape index: {}]   ;;  %s2354_s2 = inlined_call_operand.hbm [shape: bf16[2,8,256], index: 2, kind: input, shape index: {}]   ;;  %s2355_s3 = inlined_call_operand.hbm [shape: bf16[2,8,256], index: 3, kind: input, shape index: {}]   ;;  %s2356_s4 = inlined_call_operand.hbm [shape: bf16[2,8,256], index: 4, kind: input, shape index: {}]   ;;  %s2357_s5 = inlined_call_operand.hbm [shape: bf16[2,8,256], index: 5, kind: input, shape index: {}]   ;;  %s2358_s6 = inlined_call_operand.hbm [shape: bf16[256,128], index: 6, kind: input, shape index: {}]   ;;  %s2359_s7 = inlined_call_operand.vmem [shape: f32[1,256], index: 7, kind: input, shape index: {}]   ;;  %s2360_s8 = inlined_call_operand.vmem [shape: f32[1,256], index: 8, kind: input, shape index: {}]   ;;  %s2361_s9 = inlined_call_operand.hbm [shape: bf16[2,8,128], index: 9, kind: output, shape index: {}]  }
   0x1   :  { %2384 = sst [smem:[#allocation36_spill]] %s2354_s2 }
   0x2   :  { %2385 = sst [smem:[#allocation37_spill]] %s2355_s3 }
   0x3   :  { %2386 = sst [smem:[#allocation38_spill]] %s2356_s4 }
   0x4   :  { %2387 = sst [smem:[#allocation39_spill]] %s2357_s5 }
   0x5   :  { %2388 = sst [smem:[#allocation40_spill]] %s2358_s6 }
   0x6   :  { %2389 = sst [smem:[#allocation41_spill]] %s2359_s7 }
   0x7   :  { %2390 = sst [smem:[#allocation42_spill]] %s2360_s8 }
   0x8   :  { %2391 = sst [smem:[#allocation43_spill]] %s2361_s9 }
   0x9   :  { %14 = sst [smem:[#allocation4]] %s2352_s0 }
   0xa   :  { %15 = sst [smem:[#allocation5]] %s2353_s1 }
   0xb   :  { %16 = vsyncpa [#allocation7], 0 }
   0xc   :  { %18 = vsyncpa [#allocation7 + $0x1], 0 }
   0xd   :  { %19 = vsyncpa [#allocation10], 0 }
   0xe   :  { %21 = vsyncpa [#allocation10 + $0x1], 0 }
   0xf   :  { %22 = vsyncpa [#allocation13], 0 }
  0x10   :  { %24 = vsyncpa [#allocation13 + $0x1], 0 }
  0x11   :  { %25 = vsyncpa [#allocation8], 0 }
  0x12   :  { %27 = vsyncpa [#allocation8 + $0x1], 0  ;;  %s1853_s13 = smov 0   ;;  %s1855_s14 = smov 0  }
  0x13   :  { %s1857_s15 = smov 0   ;;  %s1859_s16 = smov 0  }
  0x14   :  { %s1861_s0 = smov 0   ;;  %s1863_s17 = smov 0  }
  0x15   :  { %s1865_s1 = smov 0   ;;  %s1867_s18 = smov 0  }
  0x16   :  { %s1869_s19 = smov 0   ;;  %s1871_s20 = smov 0  }
  0x17   :  { %s1873_s21 = smov 0   ;;  %s1875_s22 = smov 0  }
  0x18   :  { %s1877_s23 = smov 0   ;;  %s1879_s24 = smov 0  }
  0x19   :  { %s1881_s25 = smov 0   ;;  %s1883_s26 = smov 0  }
  0x1a   :  { %s1885_s27 = smov 0   ;;  %s1887_s28 = smov 0  }
  0x1b LB: > { %2392 = sst [smem:[#allocation22_spill]] %s1723_s13  ;;  %s1944_s29 = sadd.s32 4294967295, %s1791_s28   ;;  %s1791_s28 = sphi %s1887_s28, %s33_s28   ;;  %s1787_s27 = sphi %s1885_s27, %s2482_s27   ;;  %s1783_s26 = sphi %s1883_s26, %s2481_s26   ;;  %s1779_s25 = sphi %s1881_s25, %s2480_s25   ;;  %s1775_s24 = sphi %s1879_s24, %s2479_s24   ;;  %s1771_s23 = sphi %s1877_s23, %s2478_s23   ;;  %s1767_s22 = sphi %s1875_s22, %s2477_s22   ;;  %s1763_s21 = sphi %s1873_s21, %s2476_s21   ;;  %s1759_s20 = sphi %s1871_s20, %s2465_s20   ;;  %s1755_s19 = sphi %s1869_s19, %s2475_s19   ;;  %s1751_s18 = sphi %s1867_s18, %s2474_s18   ;;  %s1747_s1 = sphi %s1865_s1, %s2473_s1   ;;  %s1743_s17 = sphi %s1863_s17, %s2472_s17   ;;  %s1739_s0 = sphi %s1861_s0, %s2463_s0   ;;  %s1735_s16 = sphi %s1859_s16, %s2471_s16   ;;  %s1731_s15 = sphi %s1857_s15, %s2470_s15   ;;  %s1727_s14 = sphi %s1855_s14, %s2469_s14   ;;  %s1723_s13 = sphi %s1853_s13, %s2461_s13  }
  0x1c   : > { %2393 = sst [smem:[#allocation23_spill]] %s1727_s14  ;;  %p1126_p0 = scmp.ge.s32.totalorder %s1791_s28, 1 }
  0x1d   : > { %2394 = sst [smem:[#allocation24_spill]] %s1735_s16  ;;  %p2380_p1 = scmp.eq.s32.totalorder %s1944_s29, 0 }
  0x1e   : > { %2395 = sst [smem:[#allocation25_spill]] %s1739_s0  ;;  %p250_p2 = scmp.eq.s32.totalorder %s1944_s29, 1 }
  0x1f   : > { %2396 = sst [smem:[#allocation26_spill]] %s1743_s17  ;;  %p263_p3 = scmp.lt.s32.totalorder %s1791_s28, 3 }
  0x20   : > { %2397 = sst [smem:[#allocation27_spill]] %s1763_s21  ;;  %s1793_s9 = smov [#allocation14]  }
  0x21   : > { %2398 = sst [smem:[#allocation28_spill]] %s1783_s26  ;;  %p1953_p4 = pnand %p1126_p0, %p263_p3 }
  0x22   : > { %s2399_s6 = sld [smem:[#allocation40_spill]]  ;;  %s276_s26 = sshll.u32 %s1793_s9, 4  ;;  %s277_s26 = int_to_ptr.vmem [resolvable:$true] %s276_s26 }
  0x23   : > { %s2400_s12 = scalar_select %p1953_p4, 1, 0 }
  0x24   : > { %p1258_p5 = pneg %p1953_p4  ;;  %s1794_s30 = smov 64  }
  0x25   : > { %2401 = sst [smem:[#allocation29_spill]] %s2400_s12  ;;  %s1795_s10 = smov 4  }
  0x26   : > { %p1259_p7 = pnand %p1258_p5, %p2380_p1  ;;  %s1125_s9 = sadd.s32 4294967294, %s1791_s28  }
  0x27   : > { %p2381_p9 = scmp.eq.s32.totalorder %s1791_s28, 0  ;;  %s79_s8 = sld [smem:[#allocation5]] }
  0x28   : > { %s274_s11 = sshll.u32 %s2399_s6, 4  ;;  %s45_s6 = sadd.s32 1, %s1787_s27  ;;  %s275_s11 = int_to_ptr.hbm [resolvable:$true] %s274_s11 }
  0x29   : > { %1261 = dma.hbm_to_vmem [thread:$0]  (!%p1259_p7), %s275_s11, 2048, %s277_s26, [#allocation13], %s1794_s30, %s1794_s30, %s1795_s10  }
  0x2a   : > { %p47_p8 = scmp.ge.s32.totalorder %s45_s6, 2  ;;  %s86_s7 = sadd.s32 1, %s1767_s22 }
  0x2b   : > { %p93_p10 = scmp.ne.s32.totalorder %s1767_s22, %s1763_s21  ;;  %p99_p11 = scmp.ne.s32.totalorder %s1763_s21, %s1759_s20 }
  0x2c   : > { %s2484_s6 = smov (%p47_p8, %s45_s6), 0  ;;  %s1974_s11 = sld [smem:[#allocation4]] }
  0x2d   : > { %2402 = sst [smem:[#allocation30_spill]] %s2484_s6  ;;  %s51_s26 = ssub.s32 %s1787_s27, %s2484_s6 }
  0x2e   : > { %p1978_p12 = por %p93_p10, %p2381_p9  ;;  %p1984_p13 = por %p99_p11, %p2380_p1 }
  0x2f   : > { %s239_s12 = sadd.s32 1, %s1731_s15  ;;  %p249_p0 = scmp.ne.s32.totalorder %s1731_s15, %s1727_s14 }
  0x30   : > { %s2404_s10 = scalar_select %p1984_p13, 1, 0 }
  0x31   : > { %p255_p3 = scmp.ne.s32.totalorder %s1727_s14, %s1723_s13  ;;  %p1995_p5 = por %p250_p2, %p249_p0 }
  0x32   : > { %2405 = sst [smem:[#allocation31_spill]] %s2404_s10  ;;  %p1999_p7 = scmp.eq.s32.totalorder %s51_s26, 0 }
  0x33   : > { %s2406_s20 = scalar_select %p1995_p5, 1, 0 }
  0x34   : > { %p256_p8 = scmp.eq.s32.totalorder %s1125_s9, 1  ;;  %p2379_p10 = scmp.lt.s32.totalorder %s1791_s28, 2 }
  0x35   : > { %2407 = sst [smem:[#allocation32_spill]] %s2406_s20  ;;  %s2378_s14 = sshll.u32 %s1787_s27, 1 }
  0x36   : > { %s2007_s10 = scalar_select %p1999_p7, %s1767_s22, %s86_s7  }
  0x37   : > { %p2009_p11 = por %p256_p8, %p255_p3  ;;  %s321_s26 = sand.u32 1, %s1767_s22  }
  0x38   : > { %2409 = sst [smem:[#allocation33_spill]] %s2007_s10  ;;  %s1133_s5 = sshll.u32 %s321_s26, 3 }
  0x39   : > { %s2410_s13 = scalar_select %p2009_p11, 1, 0 }
  0x3a   : > { %s2019_s21 = scalar_select %p1999_p7, %s1731_s15, %s239_s12  }
  0x3b   : > { %2411 = sst [smem:[#allocation34_spill]] %s2410_s13  ;;  %s1134_s16 = sshll.u32 %s79_s8, 1 }
  0x3c   : > { %s2023_s9 = sadd.s32 %s1134_s16, %s2378_s14  ;;  %s323_s7 = scalar_lea.vmem [#allocation9], %s1133_s5 }
  0x3d   : > { %s335_s10 = sshll.u32 %s323_s7, 4  ;;  %s2377_s0 = sshll.u32 %s2023_s9, 2  ;;  %s336_s10 = int_to_ptr.vmem [resolvable:$true] %s335_s10 }
  0x3e   : > { %s2412_s3 = sld [smem:[#allocation37_spill]]  ;;  %p2035_p2 = pnand %p2379_p10, %p1978_p12 }
  0x3f   : > { %s2414_s16 = sand.u32 1, %s1791_s28  }
  0x40   : > { %s2041_s26 = scalar_lea.sflag [#allocation10], %s2414_s16  ;;  %p1481_p3 = pneg %p2035_p2 }
  0x44   : > { %s331_s20 = scalar_lea.hbm %s2412_s3, %s2377_s0  ;;  %s1484_s30 = scalar_lea.hbm %s2412_s3, 16 }
  0x45   : > { %s333_s8 = sshll.u32 %s331_s20, 4  ;;  %s334_s8 = int_to_ptr.hbm [resolvable:$true] %s333_s8 }
  0x46   : > { %s1477_s5 = sshra.s32 %s334_s8, 4  ;;  %s1478_s5 = int_to_ptr.hbm [resolvable:$true] %s1477_s5 }
  0x47   : > { %s1479_s7 = scalar_lea.hbm %s1478_s5, 8  ;;  %p1485_p12 = scmp.lt.s32.totalorder %s1478_s5, %s2412_s3 }
  0x48   : > { %p1480_p0 = scmp.ne.s32.totalorder %s1478_s5, %s1479_s7  ;;  %p1486_p10 = scmp.lt.s32.totalorder %s1484_s30, %s1479_s7 }
  0x4a   : > { %p1482_p8 = pnand %p1481_p3, %p1480_p0  ;;  %p1487_p1 = por %p1486_p10, %p1485_p12 }
  0x4c   : > { %p1483_p6 = pneg %p1482_p8 }
  0x4e   : > { %p1488_p9 = pnand %p1487_p1, %p1483_p6 }
  0x50   : > { %1491 = shalt.err (!%p1488_p9)
}
  0x51   : > { %1268 = dma.hbm_to_vmem [thread:$0]  (!%p2035_p2), %s334_s8, 128, %s336_s10, %s2041_s26  }
  0x52   : > { %s56_s14 = sadd.s32 1, %s1779_s25  ;;  %p63_p1 = scmp.ne.s32.totalorder %s1779_s25, %s1775_s24 }
  0x53   : > { %p69_p6 = scmp.ne.s32.totalorder %s1775_s24, %s1771_s23  ;;  %p2416_p9 = scmp.eq.s32.totalorder %s1791_s28, 0 }
  0x54   : > { %s2062_s0 = scalar_select %p1999_p7, %s1779_s25, %s56_s14  }
  0x55   : > { %p65_p10 = por %p2416_p9, %p63_p1  ;;  %p2417_p0 = scmp.eq.s32.totalorder %s1944_s29, 0 }
  0x56   : > { %2415 = sst [smem:[#allocation35_spill]] %s2062_s0  ;;  %s296_s12 = sand.u32 1, %s1779_s25  }
  0x57   : > { %p2068_p3 = por %p2417_p0, %p69_p6  ;;  %s1130_s16 = sshll.u32 %s1974_s11, 1 }
  0x58   : > { %s1129_s5 = sshll.u32 %s296_s12, 3  ;;  %s2419_s7 = sshll.u32 %s1787_s27, 1 }
  0x59   : > { %s2076_s13 = sadd.s32 %s2419_s7, %s1130_s16  ;;  %s300_s23 = scalar_lea.vmem [#allocation6], %s1129_s5 }
  0x5a   : > { %s2383_s10 = sshll.u32 %s2076_s13, 2  ;;  %s312_s8 = sshll.u32 %s300_s23, 4  ;;  %s313_s8 = int_to_ptr.vmem [resolvable:$true] %s312_s8 }
  0x5b   : > { %s2420_s2 = sld [smem:[#allocation36_spill]]  ;;  %p2421_p2 = scmp.lt.s32.totalorder %s1791_s28, 2 }
  0x5c   : > { %s297_s11 = scalar_lea.sflag [#allocation7], %s296_s12 }
  0x5d   : > { %p2086_p8 = pnand %p2421_p2, %p65_p10 }
  0x5f   : > { %p1511_p1 = pneg %p2086_p8 }
  0x61   : > { %s308_s14 = scalar_lea.hbm %s2420_s2, %s2383_s10  ;;  %s1514_s17 = scalar_lea.hbm %s2420_s2, 16 }
  0x62   : > { %s310_s3 = sshll.u32 %s308_s14, 4  ;;  %s311_s3 = int_to_ptr.hbm [resolvable:$true] %s310_s3 }
  0x63   : > { %s1507_s16 = sshra.s32 %s311_s3, 4  ;;  %s1508_s16 = int_to_ptr.hbm [resolvable:$true] %s1507_s16 }
  0x64   : > { %s1509_s7 = scalar_lea.hbm %s1508_s16, 8  ;;  %p1515_p10 = scmp.lt.s32.totalorder %s1508_s16, %s2420_s2 }
  0x65   : > { %p1510_p12 = scmp.ne.s32.totalorder %s1508_s16, %s1509_s7  ;;  %p1516_p0 = scmp.lt.s32.totalorder %s1514_s17, %s1509_s7 }
  0x67   : > { %p1512_p6 = pnand %p1511_p1, %p1510_p12  ;;  %p1517_p2 = por %p1516_p0, %p1515_p10 }
  0x69   : > { %p1513_p9 = pneg %p1512_p6 }
  0x6b   : > { %p1518_p11 = pnand %p1517_p2, %p1513_p9 }
  0x6d   : > { %1521 = shalt.err (!%p1518_p11)
}
  0x6e   : > { %1265 = dma.hbm_to_vmem [thread:$0]  (!%p2086_p8), %s311_s3, 128, %s313_s8, %s297_s11  }
  0x6f   : > { %s116_s12 = sadd.s32 1, %s1755_s19  ;;  %p123_p12 = scmp.ne.s32.totalorder %s1755_s19, %s1751_s18 }
  0x70   : > { %s2106_s16 = scalar_select %p1999_p7, %s1755_s19, %s116_s12  }
  0x71   : > { %p2423_p11 = scmp.eq.s32.totalorder %s1791_s28, 0  ;;  %p129_p6 = scmp.ne.s32.totalorder %s1751_s18, %s1747_s1 }
  0x72   : > { %s344_s0 = sand.u32 1, %s1755_s19   ;;  %s2424_s7 = sshll.u32 %s2023_s9, 2 }
  0x73   : > { %p125_p1 = por %p123_p12, %p2423_p11  ;;  %s2425_s4 = sld [smem:[#allocation38_spill]] }
  0x74   : > { %p2426_p9 = scmp.eq.s32.totalorder %s1944_s29, 0  ;;  %s1137_s3 = sshll.u32 %s344_s0, 3 }
  0x75   : > { %s346_s11 = scalar_lea.vmem [#allocation11], %s1137_s3  ;;  %p2428_p8 = scmp.lt.s32.totalorder %s1791_s28, 2 }
  0x76   : > { %p2120_p10 = por %p129_p6, %p2426_p9  ;;  %s358_s14 = sshll.u32 %s346_s11, 4  ;;  %s359_s14 = int_to_ptr.vmem [resolvable:$true] %s358_s14 }
  0x77   : > { %p2126_p0 = pnand %p2428_p8, %p125_p1 }
  0x79   : > { %s354_s17 = scalar_lea.hbm %s2425_s4, %s2424_s7  ;;  %p1541_p12 = pneg %p2126_p0 }
  0x7a   : > { %s356_s8 = sshll.u32 %s354_s17, 4  ;;  %s1544_s5 = scalar_lea.hbm %s2425_s4, 16  ;;  %s357_s8 = int_to_ptr.hbm [resolvable:$true] %s356_s8 }
  0x7b   : > { %s1537_s9 = sshra.s32 %s357_s8, 4  ;;  %s1538_s9 = int_to_ptr.hbm [resolvable:$true] %s1537_s9 }
  0x7c   : > { %s1539_s12 = scalar_lea.hbm %s1538_s9, 8  ;;  %p1545_p1 = scmp.lt.s32.totalorder %s1538_s9, %s2425_s4 }
  0x7d   : > { %p1540_p2 = scmp.ne.s32.totalorder %s1538_s9, %s1539_s12  ;;  %p1546_p9 = scmp.lt.s32.totalorder %s1544_s5, %s1539_s12 }
  0x7f   : > { %p1542_p11 = pnand %p1541_p12, %p1540_p2  ;;  %p1547_p8 = por %p1546_p9, %p1545_p1 }
  0x81   : > { %p1543_p6 = pneg %p1542_p11 }
  0x83   : > { %p1548_p5 = pnand %p1547_p8, %p1543_p6 }
  0x85   : > { %1551 = shalt.err (!%p1548_p5)
}
  0x86   : > { %s2430_s3 = sld [smem:[#allocation26_spill]]  ;;  %p2433_p5 = scmp.eq.s32.totalorder %s1791_s28, 0 }
  0x87   : > { %s2431_s11 = sld [smem:[#allocation25_spill]]  ;;  %p2434_p6 = scmp.eq.s32.totalorder %s1944_s29, 0 }
  0x88   : > { %s2432_s10 = sld [smem:[#allocation24_spill]]  ;;  %s2436_s5 = sshll.u32 %s2076_s13, 2 }
  0x89   : > { %1271 = dma.hbm_to_vmem [thread:$0]  (!%p2126_p0), %s357_s8, 128, %s359_s14, %s2041_s26  }
  0x8a   : > { %s2437_s26 = sld [smem:[#allocation39_spill]] }
  0x8c   : > { %s146_s9 = sadd.s32 1, %s2430_s3  ;;  %s367_s1 = sand.u32 1, %s2430_s3  }
  0x8d   : > { %p153_p2 = scmp.ne.s32.totalorder %s2430_s3, %s2431_s11  ;;  %s1141_s7 = sshll.u32 %s367_s1, 3 }
  0x8e   : > { %s2147_s12 = scalar_select %p1999_p7, %s2430_s3, %s146_s9  }
  0x8f   : > { %p155_p12 = por %p153_p2, %p2433_p5  ;;  %p159_p11 = scmp.ne.s32.totalorder %s2431_s11, %s2432_s10 }
  0x90   : > { %s2438_s8 = smov %s2437_s26  ;;  %s377_s14 = scalar_lea.hbm %s2437_s26, %s2436_s5 }
  0x91   : > { %p2156_p1 = por %p159_p11, %p2434_p6  ;;  %s369_s2 = scalar_lea.vmem [#allocation12], %s1141_s7 }
  0x92   : > { %s381_s4 = sshll.u32 %s369_s2, 4  ;;  %s379_s6 = sshll.u32 %s377_s14, 4  ;;  %s382_s4 = int_to_ptr.vmem [resolvable:$true] %s381_s4  ;;  %s380_s6 = int_to_ptr.hbm [resolvable:$true] %s379_s6 }
  0x93   : > { %p2439_p7 = scmp.lt.s32.totalorder %s1791_s28, 2  ;;  %s2441_s3 = sand.u32 1, %s1791_s28  }
  0x94   : > { %s366_s11 = scalar_lea.sflag [#allocation13], %s2441_s3  ;;  %s1567_s9 = sshra.s32 %s380_s6, 4  ;;  %s1568_s9 = int_to_ptr.hbm [resolvable:$true] %s1567_s9 }
  0x95   : > { %p2167_p0 = pnand %p2439_p7, %p155_p12  ;;  %s1569_s13 = scalar_lea.hbm %s1568_s9, 8 }
  0x96   : > { %p1570_p9 = scmp.ne.s32.totalorder %s1568_s9, %s1569_s13  ;;  %s1574_s7 = scalar_lea.hbm %s2438_s8, 16 }
  0x97   : > { %p1571_p8 = pneg %p2167_p0  ;;  %p1575_p12 = scmp.lt.s32.totalorder %s1568_s9, %s2438_s8 }
  0x98   : > { %p1576_p11 = scmp.lt.s32.totalorder %s1574_s7, %s1569_s13 }
  0x99   : > { %p1572_p2 = pnand %p1571_p8, %p1570_p9 }
  0x9a   : > { %p1577_p6 = por %p1576_p11, %p1575_p12 }
  0x9b   : > { %p1573_p5 = pneg %p1572_p2 }
  0x9d   : > { %p1578_p7 = pnand %p1577_p6, %p1573_p5 }
  0x9f   : > { %1581 = shalt.err (!%p1578_p7)
}
  0xa0   : > { %1274 = dma.hbm_to_vmem [thread:$0]  (!%p2167_p0), %s380_s6, 128, %s382_s4, %s366_s11  }
  0xa1   : > { %390 = sbr.rel (%p1953_p4) target bundleno = 1244 (0x4dc), region = 48  ;;  %s392_s26 = sand.u32 (!%p1953_p4), 1, %s1775_s24  }
  0xa2   : > { %s1146_s14 = sshll.u32 (!%p1953_p4), %s392_s26, 3  ;;  %s393_s3 = scalar_lea.sflag (!%p1953_p4), [#allocation7], %s392_s26 }
  0xa3   : > { %s2186_s2 = scalar_lea.vmem (!%p1953_p4), [#allocation6], %s1146_s14 }
  0xa6   : > { %1698 = dma.done.wait (%p2068_p3), %s393_s3, 128  }
  0xa7   : > { %1700 = vsyncadd (%p2068_p3), %s393_s3, 4294967168  ;;  %s2443_s9 = sld [smem:[#allocation27_spill]]  ;;  %s402_s10 = sand.u32 1, %s1944_s29  }
  0xa8   : > { %s403_s11 = scalar_lea.sflag [#allocation10], %s402_s10 }
  0xad   : > { %s404_s4 = sand.u32 1, %s2443_s9  }
  0xae   : > { %s1147_s6 = sshll.u32 %s404_s4, 3 }
  0xaf   : > { %s2194_s1 = scalar_lea.vmem [#allocation9], %s1147_s6 }
  0xb0   : > { %1702 = dma.done.wait (%p1984_p13), %s403_s11, 128  }
  0xb1   : > { %1704 = vsyncadd (%p1984_p13), %s403_s11, 4294967168  ;;  %s414_s7 = sand.u32 1, %s1751_s18  }
  0xb2   : > { %s1148_s5 = sshll.u32 %s414_s7, 3 }
  0xb3   : > { %s2201_s20 = scalar_lea.vmem [#allocation11], %s1148_s5 }
  0xb4   : > { %1706 = dma.done.wait (%p2120_p10), %s403_s11, 128  }
  0xb5   : > { %1708 = vsyncadd (%p2120_p10), %s403_s11, 4294967168  ;;  %s2445_s23 = sld [smem:[#allocation25_spill]]  ;;  %s423_s14 = scalar_lea.sflag [#allocation13], %s402_s10 }
  0xbb   : > { %s424_s17 = sand.u32 1, %s2445_s23  }
  0xbc   : > { %s2208_s26 = sshll.u32 %s424_s17, 3 }
  0xbd   : > { %s426_s3 = scalar_lea.vmem [#allocation12], %s2208_s26 }
  0xbe   : > { %1710 = dma.done.wait (%p2156_p1), %s423_s14, 128  }
  0xbf   : > { %1712 = vsyncadd (%p2156_p1), %s423_s14, 4294967168  ;;  %p2446_p4 = scmp.eq.s32.totalorder %s1944_s29, 0 }
  0xc1   : > { %1714 = dma.done.wait (%p2446_p4), [#allocation13], 2048   ;;  %p2447_p13 = pmov %p2446_p4 }
  0xc2   : > { %s2448_s30 = sld [smem:[#allocation23_spill]] }
  0xc3   : > { %1716 = vsyncadd (%p2447_p13), [#allocation13], 4294965248  ;;  %s2220_s13 = sld [smem:[#allocation4]] }
  0xc4   : > { %s2226_s10 = sld [smem:[#allocation5]] }
  0xc8   : > { %s475_s9 = sand.u32 1, %s2448_s30  }
  0xc9   : > { %s2224_s4 = sshll.u32 %s475_s9, 2 }
  0xca   : > { %s477_s6 = scalar_lea.vmem [#allocation15], %s2224_s4  ;;  %p1152_p3 = scmp.ne.s32.totalorder %s2226_s10, 0 }
  0xcc   : > { %489 = sbr.rel (%p1152_p3) target bundleno = 212 (0xd4), region = 72 }
  0xd1   : > { %v1796_v0 = vmov 0.0  }
  0xd2   : > { %490 = vst [vmem:[#allocation2] sm:$0xff] %v1796_v0 }
  0xd3   : > { %491 = vst [vmem:[#allocation2 + $0x8] sm:$0xff] %v1796_v0 }
  0xd4 PF: > { %p1153_p10 = scmp.ge.s32.totalorder %s2226_s10, %s2220_s13 }
  0xd5   : > { %s499_s29 = ssub.s32 (!%p1153_p10), %s2220_s13, %s2226_s10 }
  0xd6   : > { %495 = sbr.rel (%p1153_p10) target bundleno = 523 (0x20b), region = 76  ;;  %s1154_s0 = sshll.u32 (!%p1153_p10), %s499_s29, 3 }
  0xd7   : > { %s501_s11 = scvt.s32.f32 (!%p1153_p10), %s1154_s0 }
  0xdb   : > { %v496_v1 = vlaneseq  ;;  %v505_v4 = vstv %s501_s11  ;;  %v567_v14 = vld [vmem:[%s2194_s1] sm:$0xff]   ;;  %v563_v16 = vld [vmem:[%s2186_s2] sm:$0xff]   ;;  %vm538_vm0 = vcmask 1043456   ;;  %vm534_vm1 = vcmask 64512  }
  0xdc   : > { %v568_v15 = vunpack.c.h.bf16 %v567_v14  ;;  %v515_v17 = vunpack.c.l.bf16 %v567_v14  ;;  %v564_v20 = vunpack.c.h.bf16 %v563_v16  ;;  %v511_v23 = vunpack.c.l.bf16 %v563_v16  ;;  %v531_v32 = vld [vmem:[%s2201_s20] sm:$0xf]  ;;  %v584_v34 = vld [vmem:[%s2201_s20 + $0x4] sm:$0xf]  ;;  %v532_v42 = vld [vmem:[#allocation2] sm:$0xff] }
  0xdd   : > { %v497_v2 = vshrl.u32 %v496_v1, 7  ;;  %v540_v33 = vsel %vm538_vm0, %v531_v32, 0  ;;  %v591_v35 = vsel %vm538_vm0, %v584_v34, 0  ;;  %v585_v46 = vld [vmem:[#allocation2 + $0x8] sm:$0xff] }
  0xde   : > { %549 = vmatpush.bf16.msra.mxu1 %v540_v33  ;;  %600 = vmatpush.bf16.msra.mxu3 %v591_v35 }
  0xdf   : > { %v498_v3 = vcvt.s32.f32 %v497_v2 }
  0xe1   : > { %v506_v5 = vsub.f32 %v505_v4, %v498_v3  ;;  %v557_v6 = vmul.f32 -0.001955035, %v498_v3  ;;  %v502_v7 = vmul.f32 -0.2876821, %v498_v3 }
  0xe3   : > { %v560_v8 = vmul.f32 -0.001955035, %v506_v5  ;;  %v507_v9 = vmul.f32 -0.2876821, %v506_v5  ;;  %v558_v10 = vmul.f32 1.442695, %v557_v6 }
  0xe4   : > { %v503_v13 = vmul.f32 1.442695, %v502_v7 }
  0xe5   : > { %v561_v11 = vmul.f32 1.442695, %v560_v8  ;;  %v508_v12 = vmul.f32 1.442695, %v507_v9  ;;  %1431 = vpow2.f32 %v558_v10 }
  0xe7   : > { %1433 = vpow2.f32 %v561_v11 }
  0xe8   : > { %1435 = vpow2.f32 %v508_v12 }
  0xe9   : > { %1437 = vpow2.f32 %v503_v13 }
  0xeb   : > { %v1432_v18 = vpop.eup %1431 }
  0xec   : > { %v565_v28 = vmul.f32 %v1432_v18, %v564_v20 }
  0xed   : > { %v1434_v19 = vpop.eup %1433 }
  0xee   : > { %v1436_v21 = vpop.eup %1435  ;;  %v569_v22 = vmul.f32 %v1434_v19, %v568_v15  ;;  %v566_v30 = vpack.c.bf16 %v565_v28, %v565_v28 }
  0xef   : > { %v1438_v24 = vpop.eup %1437  ;;  %v516_v25 = vmul.f32 %v1436_v21, %v515_v17 }
  0xf0   : > { %v570_v26 = vpack.c.bf16 %v569_v22, %v569_v22  ;;  %v512_v29 = vmul.f32 %v1438_v24, %v511_v23 }
  0xf1   : > { %v517_v27 = vpack.c.bf16 %v516_v25, %v516_v25 }
  0xf2   : > { %578 = vmatpush.bf16.xpose.msra.mxu2 %v570_v26  ;;  %v513_v31 = vpack.c.bf16 %v512_v29, %v512_v29 }
  0xf3   : > { %525 = vmatpush.bf16.xpose.msra.mxu0 %v517_v27 }
  0xf9   : > { %579 = vmatmul.bf16.vlgmr.msra.gmra.mxu2 %v566_v30 }
  0xfa   : > { %526 = vmatmul.bf16.vlgmr.msra.gmra.mxu0 %v513_v31 }
 0x177   : > { %v527_v36 = vpop.f32.mrf.mxu0 }
 0x178   : > { %v533_v37 = vpack.c.bf16 %v527_v36, %v527_v36 }
 0x17a   : > { %1155 = vmatmul.msk.bf16.vlgmr.msra.gmra.mxu1 %vm534_vm1, %v533_v37 }
 0x17c   : > { %v580_v38 = vpop.f32.mrf.mxu2 }
 0x17d   : > { %v586_v39 = vpack.c.bf16 %v580_v38, %v580_v38 }
 0x17f   : > { %1156 = vmatmul.msk.bf16.vlgmr.msra.gmra.mxu3 %vm534_vm1, %v586_v39  ;;  %v529_v40 = vpop.f32.mrf.mxu0 }
 0x184   : > { %v582_v41 = vpop.f32.mrf.mxu2 }
 0x1f7   : > { %v551_v43 = vpop.f32.mrf.mxu1 }
 0x1f8   : > { %v555_v44 = vadd.f32 %v551_v43, %v532_v42 }
 0x1fa   : > { %556 = vst [vmem:[#allocation2] sm:$0xff] %v555_v44 }
 0x1ff   : > { %v553_v45 = vpop.f32.mrf.mxu1 }
 0x202   : > { %v602_v47 = vpop.f32.mrf.mxu3 }
 0x203   : > { %v606_v48 = vadd.f32 %v602_v47, %v585_v46 }
 0x205   : > { %607 = vst [vmem:[#allocation2 + $0x8] sm:$0xff] %v606_v48 }
 0x20a   : > { %v604_v49 = vpop.f32.mrf.mxu3 }
 0x20b PF: > { %p1157_p1 = scmp.ne.s32.totalorder %s2226_s10, %s2220_s13 }
 0x20c   : > { %s2449_s7 = sld [smem:[#allocation41_spill]] (!%p1157_p1) }
 0x20d   : > { %611 = sbr.rel (%p1157_p1) target bundleno = 1221 (0x4c5), region = 80  ;;  %s2450_s23 = sld [smem:[#allocation42_spill]] (!%p1157_p1) }
 0x212   : > { %v671_v50 = vld [vmem:[%s2194_s1 + $0x4] sm:$0xf]  ;;  %v625_v51 = vld [vmem:[%s2194_s1] sm:$0xf]  ;;  %vm647_vm2 = vcmask 1043456   ;;  %v612_v56 = vlaneseq  ;;  %vm643_vm4 = vcmask 64512  }
 0x213   : > { %679 = vmatpush.bf16.xpose.msra.mxu2 %v671_v50  ;;  %633 = vmatpush.bf16.xpose.msra.mxu0 %v625_v51  ;;  %v686_v52 = vld [vmem:[%s2201_s20 + $0x4] sm:$0xf]  ;;  %v624_v55 = vld [vmem:[%s2186_s2] sm:$0xf]  ;;  %v687_v18 = vld [vmem:[#allocation2 + $0x8] sm:$0xff] }
 0x214   : > { %v693_v53 = vsel %vm647_vm2, %v686_v52, 0  ;;  %v670_v54 = vld [vmem:[%s2186_s2 + $0x4] sm:$0xf]  ;;  %v613_v57 = vshrl.u32 %v612_v56, 7  ;;  %v615_v58 = vand.u32 127, %v612_v56  ;;  %v641_v21 = vld [vmem:[#allocation2] sm:$0xff] }
 0x215   : > { %v640_v61 = vld [vmem:[%s2201_s20] sm:$0xf]  ;;  %v1243_v34 = vld [vmem:[#allocation14 + $0x78] sm:$0xff]  ;;  %v1242_v35 = vld [vmem:[#allocation14 + $0x70] sm:$0xff] }
 0x216   : > { %v617_v59 = vsub.s32 %v613_v57, %v615_v58  ;;  %vm616_vm3 = vcmp.ge.s32.totalorder %v613_v57, %v615_v58  ;;  %v649_v62 = vsel %vm647_vm2, %v640_v61, 0  ;;  %vm710_vm5 = vcmp.lt.s32.totalorder %v615_v58, 8  ;;  %925 = vmatpush.bf16.msra.mxu3 %v1243_v34  ;;  %v1235_v36 = vld [vmem:[#allocation14 + $0x38] sm:$0xff]  ;;  %v1241_v37 = vld [vmem:[#allocation14 + $0x68] sm:$0xff]  ;;  %v1234_v38 = vld [vmem:[#allocation14 + $0x30] sm:$0xff] }
 0x217   : > { %912 = vmatpush.bf16.msra.mxu1 %v1235_v36  ;;  %v1240_v39 = vld [vmem:[#allocation14 + $0x60] sm:$0xff]  ;;  %v1233_v40 = vld [vmem:[#allocation14 + $0x28] sm:$0xff]  ;;  %v1239_v41 = vld [vmem:[#allocation14 + $0x58] sm:$0xff] }
 0x218   : > { %v618_v60 = vcvt.s32.f32 %v617_v59  ;;  %v1232_v42 = vld [vmem:[#allocation14 + $0x20] sm:$0xff]  ;;  %v1238_v43 = vld [vmem:[#allocation14 + $0x50] sm:$0xff]  ;;  %v1231_v44 = vld [vmem:[#allocation14 + $0x18] sm:$0xff] }
 0x219   : > { %v1237_v45 = vld [vmem:[#allocation14 + $0x48] sm:$0xff]  ;;  %v1230_v46 = vld [vmem:[#allocation14 + $0x10] sm:$0xff]  ;;  %v1236_v47 = vld [vmem:[#allocation14 + $0x40] sm:$0xff] }
 0x21a   : > { %680 = vmatmul.bf16.vlgmr.msra.gmra.mxu2 %v670_v54  ;;  %634 = vmatmul.bf16.vlgmr.msra.gmra.mxu0 %v624_v55  ;;  %v619_v63 = vsel %vm616_vm3, %v618_v60, 0.0  ;;  %v1229_v49 = vld [vmem:[#allocation14 + $0x8] sm:$0xff]  ;;  %v1228_v51 = vld [vmem:[#allocation14] sm:$0xff]  ;;  %v761_v61 = vld [vmem:[%s2449_s7] sm:$0x3] }
 0x21b   : > { %702 = vmatpush.bf16.msrb.mxu2 %v693_v53  ;;  %658 = vmatpush.bf16.msrb.mxu0 %v649_v62  ;;  %v620_v0 = vmul.f32 -0.2876821, %v619_v63  ;;  %v666_v2 = vmul.f32 -0.001955035, %v619_v63 }
 0x21c   : > { %926 = vmatpush.bf16.msra.mxu3 %v1242_v35  ;;  %913 = vmatpush.bf16.msra.mxu1 %v1234_v38 }
 0x21d   : > { %v621_v1 = vmul.f32 1.442695, %v620_v0  ;;  %v667_v3 = vmul.f32 1.442695, %v666_v2  ;;  %v764_v2 = vperm.slane %v761_v61, 1 }
 0x21f   : > { %1439 = vpow2.f32 %v621_v1  ;;  %v769_v1 = vld [vmem:[%s2450_s23] sm:$0x3] }
 0x220   : > { %1441 = vpow2.f32 %v667_v3  ;;  %927 = vmatpush.bf16.msra.mxu3 %v1241_v37  ;;  %914 = vmatpush.bf16.msra.mxu1 %v1233_v40 }
 0x224   : > { %928 = vmatpush.bf16.msra.mxu3 %v1240_v39  ;;  %915 = vmatpush.bf16.msra.mxu1 %v1232_v42 }
 0x225   : > { %v1440_v4 = vpop.eup %1439 }
 0x226   : > { %v623_v5 = vsel %vm616_vm3, %v1440_v4, 0.0  ;;  %v1442_v7 = vpop.eup %1441 }
 0x227   : > { %v669_v10 = vsel %vm616_vm3, %v1442_v7, 0.0  ;;  %v772_v7 = vperm.slane %v769_v1, 1 }
 0x228   : > { %929 = vmatpush.bf16.msra.mxu3 %v1239_v41  ;;  %916 = vmatpush.bf16.msra.mxu1 %v1231_v44 }
 0x22c   : > { %930 = vmatpush.bf16.msra.mxu3 %v1238_v43  ;;  %917 = vmatpush.bf16.msra.mxu1 %v1230_v46 }
 0x230   : > { %931 = vmatpush.bf16.msra.mxu3 %v1237_v45  ;;  %918 = vmatpush.bf16.msra.mxu1 %v1229_v49 }
 0x234   : > { %932 = vmatpush.bf16.msra.mxu3 %v1236_v47  ;;  %919 = vmatpush.bf16.msra.mxu1 %v1228_v51 }
 0x297   : > { %v635_v6 = vpop.f32.mrf.mxu0 }
 0x298   : > { %v639_v8 = vmul.f32 %v635_v6, %v623_v5  ;;  %v777_v5 = vld [vmem:[%s426_s3] sm:$0xff] }
 0x29a   : > { %v642_v9 = vpack.c.bf16 %v639_v8, %v639_v8 }
 0x29c   : > { %1158 = vmatmul.msk.bf16.vlgmr.msrb.gmra.mxu0 %vm643_vm4, %v642_v9 }
 0x29d   : > { %v681_v11 = vpop.f32.mrf.mxu2 }
 0x29e   : > { %v685_v12 = vmul.f32 %v681_v11, %v669_v10  ;;  %v779_v10 = vunpack.c.h.bf16 %v777_v5 }
 0x29f   : > { %v637_v13 = vpop.f32.mrf.mxu0 }
 0x2a0   : > { %v688_v14 = vpack.c.bf16 %v685_v12, %v685_v12 }
 0x2a2   : > { %1159 = vmatmul.msk.bf16.vlgmr.msrb.gmra.mxu2 %vm643_vm4, %v688_v14 }
 0x2a5   : > { %v683_v15 = vpop.f32.mrf.mxu2 }
 0x2a6   : > { %v763_v15 = vperm.slane %v761_v61, 0 }
 0x319   : > { %v660_v16 = vpop.f32.mrf.mxu0 }
 0x31a   : > { %v664_v22 = vadd.f32 %v660_v16, %v641_v21  ;;  %v778_v21 = vunpack.c.l.bf16 %v777_v5 }
 0x321   : > { %v662_v17 = vpop.f32.mrf.mxu0 }
 0x325   : > { %v704_v19 = vpop.f32.mrf.mxu2 }
 0x326   : > { %v708_v20 = vadd.f32 %v704_v19, %v687_v18  ;;  %v771_v19 = vperm.slane %v769_v1, 0 }
 0x328   : > { %737 = vadd.xlane.f32.xlu0 %v708_v20 }
 0x32d   : > { %v706_v23 = vpop.f32.mrf.mxu2 }
 0x330   : > { %712 = vadd.xlane.f32.xlu0 %v664_v22 }
 0x39b   : > { %v738_v24 = vpop.xlane.xlu0 %737 }
 0x39c   : > { %v739_v25 = vmul.f32 0.125, %v738_v24 }
 0x39e   : > { %v740_v26 = vsub.f32 %v708_v20, %v739_v25 }
 0x3a0   : > { %v2249_v27 = vsel %vm710_vm5, %v740_v26, 0.0 }
 0x3a1   : > { %v742_v28 = vmul.f32 %v2249_v27, %v2249_v27 }
 0x3a3   : > { %743 = vadd.xlane.f32.xlu1 %v742_v28  ;;  %v713_v29 = vpop.xlane.xlu0 %712 }
 0x3a4   : > { %v714_v30 = vmul.f32 0.125, %v713_v29 }
 0x3a6   : > { %v715_v31 = vsub.f32 %v664_v22, %v714_v30 }
 0x3a8   : > { %v2253_v32 = vsel %vm710_vm5, %v715_v31, 0.0 }
 0x3a9   : > { %v719_v33 = vmul.f32 %v2253_v32, %v2253_v32 }
 0x3ab   : > { %720 = vadd.xlane.f32.xlu1 %v719_v33 }
 0x416   : > { %v744_v48 = vpop.xlane.xlu1 %743 }
 0x417   : > { %v745_v50 = vmul.f32 0.125, %v744_v48 }
 0x419   : > { %v746_v52 = vadd.f32 1e-05, %v745_v50 }
 0x41b   : > { %1443 = vrsqrt.f32 %v746_v52  ;;  %vm753_vm7 = vweird.f32 %v746_v52 }
 0x41e   : > { %v721_v53 = vpop.xlane.xlu1 %720 }
 0x41f   : > { %v722_v54 = vmul.f32 0.125, %v721_v53 }
 0x421   : > { %v1444_v55 = vpop.eup %1443  ;;  %v723_v56 = vadd.f32 1e-05, %v722_v54 }
 0x422   : > { %v748_v57 = vmul.f32 %v1444_v55, %v746_v52  ;;  %vm754_vm6 = vweird.f32 %v1444_v55 }
 0x423   : > { %1445 = vrsqrt.f32 %v723_v56  ;;  %vm755_vm8 = vmor %vm753_vm7, %vm754_vm6  ;;  %vm730_vm10 = vweird.f32 %v723_v56 }
 0x424   : > { %v749_v58 = vmul.f32 %v1444_v55, %v748_v57 }
 0x426   : > { %v750_v59 = vmul.f32 0.5, %v749_v58 }
 0x428   : > { %v751_v60 = vsub.f32 1.5, %v750_v59 }
 0x429   : > { %v1446_v62 = vpop.eup %1445 }
 0x42a   : > { %v752_v63 = vmul.f32 %v1444_v55, %v751_v60  ;;  %v725_v0 = vmul.f32 %v1446_v62, %v723_v56  ;;  %vm731_vm9 = vweird.f32 %v1446_v62 }
 0x42b   : > { %vm732_vm11 = vmor %vm730_vm10, %vm731_vm9 }
 0x42c   : > { %v756_v3 = vsel %vm755_vm8, %v1444_v55, %v752_v63  ;;  %v726_v4 = vmul.f32 %v1446_v62, %v725_v0 }
 0x42d   : > { %v757_v6 = vmul.f32 %v756_v3, %v2249_v27 }
 0x42e   : > { %v727_v8 = vmul.f32 0.5, %v726_v4 }
 0x42f   : > { %758 = vst [vmem:[#allocation2 + $0x8] sm:$0xff] %v757_v6  ;;  %v768_v9 = vmul.f32 %v764_v2, %v757_v6 }
 0x430   : > { %v728_v11 = vsub.f32 1.5, %v727_v8 }
 0x431   : > { %v776_v12 = vadd.f32 %v772_v7, %v768_v9 }
 0x432   : > { %v729_v13 = vmul.f32 %v1446_v62, %v728_v11 }
 0x433   : > { %v781_v14 = vmul.f32 %v779_v10, %v776_v12 }
 0x434   : > { %v733_v16 = vsel %vm732_vm11, %v1446_v62, %v729_v13 }
 0x435   : > { %v734_v17 = vmul.f32 %v733_v16, %v2253_v32  ;;  %v783_v18 = vpack.c.bf16 %v781_v14, %v781_v14 }
 0x437   : > { %735 = vst [vmem:[#allocation2] sm:$0xff] %v734_v17  ;;  %933 = vmatmul.bf16.vlgmr.msra.gmra.mxu3 %v783_v18  ;;  %v767_v20 = vmul.f32 %v763_v15, %v734_v17 }
 0x439   : > { %v775_v22 = vadd.f32 %v771_v19, %v767_v20 }
 0x43b   : > { %v780_v23 = vmul.f32 %v778_v21, %v775_v22 }
 0x43d   : > { %v782_v24 = vpack.c.bf16 %v780_v23, %v780_v23 }
 0x43f   : > { %920 = vmatmul.bf16.vlgmr.msra.gmra.mxu1 %v782_v24 }
 0x4ba   : > { %v934_v25 = vpop.f32.mrf.mxu3 }
 0x4bc   : > { %v921_v26 = vpop.f32.mrf.mxu1 }
 0x4bd   : > { %v935_v27 = vadd.f32 %v934_v25, %v921_v26 }
 0x4bf   : > { %v938_v28 = vpack.c.bf16 %v935_v27, %v935_v27 }
 0x4c1   : > { %939 = vst [vmem:[%s477_s6] sm:$0xf] %v938_v28 }
 0x4c2   : > { %v936_v29 = vpop.f32.mrf.mxu3 }
 0x4c4   : > { %v923_v30 = vpop.f32.mrf.mxu1 }
 0x4c5 PF: > { %s948_s17 = sld [smem:[#allocation4]]  ;;  %s955_s30 = sshll.u32 %s477_s6, 4  ;;  %s956_s30 = int_to_ptr.vmem [resolvable:$true] %s955_s30 }
 0x4c6   : > { %s2451_s26 = sld [smem:[#allocation28_spill]]  ;;  %s941_s7 = scalar_lea.sflag [#allocation8], %s475_s9 }
 0x4c7   : > { %s2453_s3 = sld [smem:[#allocation32_spill]] }
 0x4c8   : > { %s2454_s11 = sld [smem:[#allocation43_spill]] }
 0x4cc   : > { %s951_s13 = sadd.s32 %s2451_s26, %s948_s17 }
 0x4cd   : > { %s1225_s10 = sshll.u32 %s951_s13, 2  ;;  %p2455_p9 = scmp.ne.s32.totalorder %s2453_s3, 0 }
 0x4ce   : > { %s953_s2 = scalar_lea.hbm %s2454_s11, %s1225_s10  ;;  %s1617_s23 = scalar_lea.hbm %s2454_s11, 8 }
 0x4cf   : > { %s957_s1 = sshll.u32 %s953_s2, 4  ;;  %s958_s1 = int_to_ptr.hbm [resolvable:$true] %s957_s1 }
 0x4d0   : > { %s1611_s5 = sshra.s32 %s958_s1, 4  ;;  %s1612_s5 = int_to_ptr.hbm [resolvable:$true] %s1611_s5 }
 0x4d1   : > { %s1613_s20 = scalar_lea.hbm %s1612_s5, 4  ;;  %p1618_p5 = scmp.lt.s32.totalorder %s1612_s5, %s2454_s11 }
 0x4d2   : > { %p1614_p0 = scmp.ne.s32.totalorder %s1612_s5, %s1613_s20  ;;  %p1619_p12 = scmp.lt.s32.totalorder %s1617_s23, %s1613_s20 }
 0x4d4   : > { %p1615_p8 = pnand %p1614_p0, %p2455_p9  ;;  %p1620_p11 = por %p1619_p12, %p1618_p5 }
 0x4d6   : > { %p1616_p2 = pneg %p1615_p8 }
 0x4d8   : > { %p1621_p6 = pnand %p1620_p11, %p1616_p2 }
 0x4da   : > { %1624 = shalt.err (!%p1621_p6)
}
 0x4db   : > { %1256 = dma.vmem_to_hbm [thread:$0]  (%p2455_p9), %s956_s30, 64, %s958_s1, %s941_s7  }
 0x4dc PF: > { %s2456_s9 = sld [smem:[#allocation22_spill]]  ;;  %p2459_p4 = scmp.ge.s32.totalorder %s1791_s28, 2 }
 0x4dd   : > { %s2457_s14 = sld [smem:[#allocation34_spill]] }
 0x4e2   : > { %s969_s13 = sand.u32 1, %s2456_s9  }
 0x4e3   : > { %p2458_p7 = scmp.ne.s32.totalorder %s2457_s14, 0  ;;  %s970_s10 = scalar_lea.sflag [#allocation8], %s969_s13 }
 0x4e5   : > { %p1276_p13 = pnand %p2459_p4, %p2458_p7 }
 0x4e7   : > { %p1277_p3 = pneg %p1276_p13 }
 0x4e9   : > { %1718 = dma.done.wait (%p1277_p3), %s970_s10, 64  }
 0x4ea   : > { %1720 = vsyncadd (%p1277_p3), %s970_s10, 4294967232  ;;  %s33_s28 = sadd.s32 1, %s1791_s28   ;;  %s2461_s13 = sld [smem:[#allocation23_spill]] }
 0x4eb   : > { %p2293_p10 = scmp.ge.s32.totalorder %s33_s28, 4   ;;  %s2462_s3 = sld [smem:[#allocation25_spill]] }
 0x4ec   : > { %s2463_s0 = sld [smem:[#allocation26_spill]]  ;;  %s2464_s30 = smov %s2106_s16 }
 0x4ed   : > { %s2465_s20 = sld [smem:[#allocation27_spill]]  ;;  %s2469_s14 = smov %s1731_s15 }
 0x4ee   : > { %s2466_s2 = sld [smem:[#allocation33_spill]]  ;;  %s2470_s15 = smov %s2019_s21 }
 0x4ef   : > { %s2467_s7 = sld [smem:[#allocation35_spill]]  ;;  %s2472_s17 = smov %s2147_s12 }
 0x4f0   : > { %s2468_s5 = sld [smem:[#allocation30_spill]]  ;;  %s2473_s1 = smov %s1751_s18 }
 0x4f1   : > { %s2471_s16 = smov %s2462_s3  ;;  %s2474_s18 = smov %s1755_s19 }
 0x4f2   : > { %s2475_s19 = smov %s2464_s30  ;;  %s2476_s21 = smov %s1767_s22 }
 0x4f3   : > { %s2478_s23 = smov %s1775_s24  ;;  %s2479_s24 = smov %s1779_s25 }
 0x4f4   : > { %s2477_s22 = smov %s2466_s2  ;;  %s2481_s26 = smov %s1787_s27 }
 0x4f5   : > { %s2480_s25 = smov %s2467_s7  ;;  %32 = sbr.rel (!%p2293_p10) target bundleno = 27 (0x1b), region = 146 }
 0x4f6   : > { %s2482_s27 = smov %s2468_s5 }
 0x4fa   :  { %976 = vsyncpa [#allocation7], 1 }
 0x4fb   :  { %978 = vsyncpa [#allocation7 + $0x1], 1 }
 0x4fc   :  { %979 = vsyncpa [#allocation10], 1 }
 0x4fd   :  { %981 = vsyncpa [#allocation10 + $0x1], 1 }
 0x4fe   :  { %982 = vsyncpa [#allocation13], 1 }
 0x4ff   :  { %984 = vsyncpa [#allocation13 + $0x1], 1 }
 0x500   :  { %985 = vsyncpa [#allocation8], 1 }
 0x501   :  { %987 = vsyncpa [#allocation8 + $0x1], 1 }

</bundles_post_ra>
